<compile_context>
chip_gen: v5e
topology: v5e:2x2
jax: 0.10.0
libtpu: 0.0.40
codegen_flags: <defaults>
</compile_context>

<pallas_src>
import numpy as np
import jax
import jax.numpy as jnp
from jax.experimental import pallas as pl
from jax.experimental.pallas import tpu as pltpu


def _full_spec(shape):
    n = len(shape)
    return pl.BlockSpec(shape, lambda i, n=n: (0,) * n)


# ----------------------------------------------------------------------------
# Fused kernel factory: LSTM recurrence + relu(H) slab + conv + TPA + heads.
# ----------------------------------------------------------------------------
def _make_kernel(n_layers):
    L = n_layers

    def kernel(xg0_ref, whh0_ref, wcat_ref, bcat_ref, gmul_ref, gadd_ref,
               wconvx_ref, bconvx_ref, rsel_ref, ssel_ref,
               w1T_ref, b1_ref, w2T_ref, b2_ref, w3T_ref, b3_ref,
               y_ref, hbuf_ref):
        T, B, G = xg0_ref.shape
        Hs = G // 4

        # Hoist every weight load out of the recurrence.
        whh0 = whh0_ref[...]                              # (Hs, 4Hs), i/f/o cols pre-scaled
        gmul = gmul_ref[...]                              # (1, 4Hs)
        gadd = gadd_ref[...]                              # (1, 4Hs)
        wcats = [wcat_ref[l] for l in range(L - 1)]       # (2Hs, 4Hs) each, pre-scaled
        bcats = [bcat_ref[l] for l in range(L - 1)]       # (1, 4Hs) each, pre-scaled

        def cell(gates_scaled, c_prev):
            # One full-width tanh (single EUP push); per-lane affine recovers sigmoid
            # on the 0.5-pre-scaled i/f/o columns and identity (tanh) on the g column.
            t_all = jnp.tanh(gates_scaled)
            act = t_all * gmul + gadd
            i_g = act[:, 0 * Hs:1 * Hs]
            f_g = act[:, 1 * Hs:2 * Hs]
            g_g = act[:, 2 * Hs:3 * Hs]
            o_g = act[:, 3 * Hs:4 * Hs]
            c_new = f_g * c_prev + i_g * g_g
            h_new = o_g * jnp.tanh(c_new)
            return h_new, c_new

        def step(t, carry):
            hs, cs = carry
            # Layer 0: input contribution + bias precomputed in the wrapper (xg0).
            g0 = xg0_ref[t] + jnp.dot(hs[0], whh0, preferred_element_type=jnp.float32)
            h_new, c_new = cell(g0, cs[0])
            new_h, new_c = [h_new], [c_new]
            inp = h_new
            for l in range(1, L):
                zh = jnp.concatenate([inp, hs[l]], axis=1)                # (B, 2Hs)
                g = (jnp.dot(zh, wcats[l - 1], preferred_element_type=jnp.float32)
                     + bcats[l - 1])
                h_new, c_new = cell(g, cs[l])
                new_h.append(h_new)
                new_c.append(c_new)
                inp = h_new
            # relu(top hidden) straight into the 2-D VMEM slab (row t*B + b).
            # The t = T-1 rows are written but never read (no conditional on the chain).
            hbuf_ref[pl.ds(t * B, B), :] = jnp.maximum(inp, 0.0)
            return (tuple(new_h), tuple(new_c))

        zero = tuple(jnp.zeros((B, Hs), jnp.float32) for _ in range(L))
        hs, _ = jax.lax.fori_loop(0, T, step, (zero, zero), unroll=True)
        htt = hs[L - 1]                                                   # (B, Hs)

        # ---- Temporal pattern attention epilogue (all 2-D, MXU-friendly) ----
        # Conv2d(1, fn, (T-1, 1)) over all batches as ONE matmul with the batch-expanded
        # conv weight built in the wrapper:
        #   convBM[b*fn + c, p] = sum_t wconv[c, t] * relu(Htop[t, b, p]) + bconv[c]
        slab = hbuf_ref[pl.ds(0, (T - 1) * B), :]                         # ((T-1)*B, Hs)
        convBM = (jnp.dot(wconvx_ref[...], slab, preferred_element_type=jnp.float32)
                  + bconvx_ref[...])
        convBM = jnp.maximum(convBM, 0.0)                                 # (B*fn, Hs)

        # w = linear1(htt); broadcast to the fn rows of each batch block via a selector matmul.
        w = jnp.dot(htt, w1T_ref[...], preferred_element_type=jnp.float32) + b1_ref[...]  # (B, fn)
        w_rows = jnp.dot(rsel_ref[...], w, preferred_element_type=jnp.float32)            # (B*fn, fn)

        s_flat = jnp.sum(convBM * w_rows, axis=1, keepdims=True)          # (B*fn, 1)
        alpha = 0.5 * jnp.tanh(0.5 * s_flat) + 0.5                        # sigmoid, (B*fn, 1)
        # v[b, :] = sum_i alpha[b, i] * conv_vecs[b, i, :] -> block-row sum via selector matmul.
        v = jnp.dot(ssel_ref[...], alpha * convBM,
                    preferred_element_type=jnp.float32)                   # (B, fn)

        concat = jnp.concatenate([htt, v], axis=1)                        # (B, Hs + fn)
        new_ht = (jnp.dot(concat, w2T_ref[...], preferred_element_type=jnp.float32)
                  + b2_ref[...])
        y_ref[...] = (jnp.dot(new_ht, w3T_ref[...], preferred_element_type=jnp.float32)
                      + b3_ref[...])

    return kernel


# ----------------------------------------------------------------------------
# Wrapper: weight prep (transposes, gate fusion, 0.5 pre-scale, batch-expanded
# conv weight, selector matrices) + one pallas_call.
# ----------------------------------------------------------------------------
def tpalstm_forward(x, params):
    B, T = x.shape
    Hs = params["hidden_w"].shape[0]
    L = int(params["n_layers"])
    fn = params["conv_w"].shape[0]
    filter_size = int(params["filter_size"])
    attn_len = params["conv_w"].shape[2]
    out_h = params["lin_w"].shape[0]

    assert filter_size == 1, "conv-as-matmul collapse requires filter_size == 1"
    assert attn_len == T - 1
    feat = Hs - filter_size + 1
    assert fn == feat == Hs, "identity conv-view fast path requires filter_num == feat_size == hidden"
    assert params["hidden_w"].shape[1] == 1, "forward views x as (B, T, 1)"

    f32 = jnp.float32
    # Column scale for the single-tanh gate trick: 0.5 on i/f/o columns, 1.0 on g.
    colscale = jnp.concatenate([jnp.full((Hs,), 0.5, f32), jnp.full((Hs,), 0.5, f32),
                                jnp.ones((Hs,), f32), jnp.full((Hs,), 0.5, f32)])
    gmul = colscale[None, :]                                             # 0.5 | 0.5 | 1 | 0.5
    gadd = jnp.concatenate([jnp.full((Hs,), 0.5, f32), jnp.full((Hs,), 0.5, f32),
                            jnp.zeros((Hs,), f32), jnp.full((Hs,), 0.5, f32)])[None, :]

    # Input projection hoisted out of the recurrence.
    x_t = jnp.transpose(x, (1, 0)).astype(f32)                           # (T, B)
    xc = jax.nn.relu(x_t[:, :, None] * params["hidden_w"][:, 0][None, None, :]
                     + params["hidden_b"][None, None, :]).astype(f32)    # (T, B, Hs)

    # Layer-0 input gate contribution (+ fused bias), pre-scaled, hoisted off the serial chain.
    b0 = params["b_ih"][0] + params["b_hh"][0]
    xg0 = ((jnp.einsum('tbh,gh->tbg', xc, params["w_ih"][0]) + b0[None, None, :])
           * colscale[None, None, :]).astype(f32)                        # (T, B, 4Hs)
    whh0 = (params["w_hh"][0].T * colscale[None, :]).astype(f32)         # (Hs, 4Hs)

    # Layers 1..L-1: fused [w_ih.T ; w_hh.T] weights and biases, pre-scaled.
    if L > 1:
        wcat = jnp.stack([jnp.concatenate([params["w_ih"][l].T, params["w_hh"][l].T],
                                          axis=0) * colscale[None, :]
                          for l in range(1, L)]).astype(f32)             # (L-1, 2Hs, 4Hs)
        bcat = jnp.stack([((params["b_ih"][l] + params["b_hh"][l]) * colscale)[None, :]
                          for l in range(1, L)]).astype(f32)             # (L-1, 1, 4Hs)
    else:  # dummy block (never read in-kernel); keeps Pallas input shapes non-empty
        wcat = jnp.zeros((1, 2 * Hs, 4 * Hs), f32)
        bcat = jnp.zeros((1, 1, 4 * Hs), f32)

    # Batch-expanded conv weight: convBM[b*fn + c, :] = sum_t wconv[c, t] * slab[t*B + b, :].
    wc = params["conv_w"][:, 0, :, 0].astype(f32)                        # (fn, T-1)
    eyeB = jnp.eye(B, dtype=f32)
    wconvx = (wc[None, :, :, None] * eyeB[:, None, None, :]).reshape(B * fn, (T - 1) * B)
    bconvx = jnp.tile(params["conv_b"], (B,))[:, None].astype(f32)       # (B*fn, 1)

    # Selector matrices: per-batch row broadcast and per-batch block-row reduction.
    rsel = jnp.repeat(eyeB, fn, axis=0).astype(f32)                      # (B*fn, B)
    ssel = rsel.T                                                        # (B, B*fn)

    w1T = params["lin1_w"].T.astype(f32)
    b1 = params["lin1_b"][None, :].astype(f32)
    w2T = params["lin2_w"].T.astype(f32)
    b2 = params["lin2_b"][None, :].astype(f32)
    w3T = params["lin_w"].T.astype(f32)
    b3 = params["lin_b"][None, :].astype(f32)

    ins = (xg0, whh0, wcat, bcat, gmul, gadd, wconvx, bconvx, rsel, ssel,
           w1T, b1, w2T, b2, w3T, b3)

    flops = int(2 * T * B * Hs * 4 * Hs                       # layer-0 recurrent dots
                + 2 * T * max(L - 1, 0) * B * 2 * Hs * 4 * Hs  # upper-layer fused dots
                + 2 * (B * fn) * ((T - 1) * B) * Hs            # conv matmul
                + 2 * B * Hs * fn + 2 * (B * fn) * B * fn      # linear1 + row broadcast
                + 2 * B * (B * fn) * Hs                        # v selector matmul
                + 2 * B * (Hs + fn) * Hs + 2 * B * Hs * out_h)
    transcendentals = int(T * L * B * 5 * Hs + B * fn)
    bytes_accessed = int(sum(int(np.prod(a.shape)) for a in ins) * 4 + B * out_h * 4)

    ypred = pl.pallas_call(
        _make_kernel(L),
        grid=(1,),
        in_specs=[_full_spec(a.shape) for a in ins],
        out_specs=_full_spec((B, out_h)),
        out_shape=jax.ShapeDtypeStruct((B, out_h), jnp.float32),
        scratch_shapes=[pltpu.VMEM((T * B, Hs), jnp.float32)],
        compiler_params=pltpu.CompilerParams(dimension_semantics=("arbitrary",)),
        cost_estimate=pl.CostEstimate(flops=flops,
                                      transcendentals=transcendentals,
                                      bytes_accessed=bytes_accessed),
    )(*ins)
    return ypred


# ----------------------------------------------------------------------------
# Deterministic parameter init (PyTorch shapes) + pure-JAX reference.
# ----------------------------------------------------------------------------
def init_params(key, input_size, output_horizon, hidden_size, obs_len, n_layers):
    filter_num, filter_size = 32, 1
    attn_len = obs_len - 1
    keys = jax.random.split(key, 16)

    def rnd(k, shape, scale=0.1):
        return (scale * jax.random.normal(k, shape)).astype(jnp.float32)

    params = dict(
        n_layers=n_layers,
        filter_size=filter_size,
        hidden_w=rnd(keys[0], (hidden_size, input_size)),
        hidden_b=rnd(keys[1], (hidden_size,)),
        conv_w=rnd(keys[2], (filter_num, 1, attn_len, filter_size)),
        conv_b=rnd(keys[3], (filter_num,)),
        lin1_w=rnd(keys[4], (filter_num, hidden_size)),
        lin1_b=rnd(keys[5], (filter_num,)),
        lin2_w=rnd(keys[6], (hidden_size, hidden_size + filter_num)),
        lin2_b=rnd(keys[7], (hidden_size,)),
        lin_w=rnd(keys[8], (output_horizon, hidden_size)),
        lin_b=rnd(keys[9], (output_horizon,)),
    )
    lkeys = jax.random.split(keys[10], 4 * n_layers)
    w_ih, w_hh, b_ih, b_hh = [], [], [], []
    for l in range(n_layers):
        w_ih.append(rnd(lkeys[4 * l + 0], (4 * hidden_size, hidden_size)))
        w_hh.append(rnd(lkeys[4 * l + 1], (4 * hidden_size, hidden_size)))
        b_ih.append(rnd(lkeys[4 * l + 2], (4 * hidden_size,)))
        b_hh.append(rnd(lkeys[4 * l + 3], (4 * hidden_size,)))
    params.update(w_ih=w_ih, w_hh=w_hh, b_ih=b_ih, b_hh=b_hh)
    return params


def tpalstm_reference(x, params):
    B, T = x.shape
    Hs = params["hidden_w"].shape[0]
    L = params["n_layers"]
    fn = params["conv_w"].shape[0]
    feat = Hs - params["filter_size"] + 1

    xc = jax.nn.relu(jnp.einsum('bti,hi->bth', x[:, :, None], params["hidden_w"])
                     + params["hidden_b"])
    h = jnp.zeros((L, B, Hs), jnp.float32)
    c = jnp.zeros((L, B, Hs), jnp.float32)
    Hbuf = []
    for t in range(T):
        inp = xc[:, t, :]
        new_h, new_c = [], []
        for l in range(L):
            gates = (inp @ params["w_ih"][l].T + h[l] @ params["w_hh"][l].T
                     + params["b_ih"][l] + params["b_hh"][l])
            i_g = jax.nn.sigmoid(gates[:, 0 * Hs:1 * Hs])
            f_g = jax.nn.sigmoid(gates[:, 1 * Hs:2 * Hs])
            g_g = jnp.tanh(gates[:, 2 * Hs:3 * Hs])
            o_g = jax.nn.sigmoid(gates[:, 3 * Hs:4 * Hs])
            cn = f_g * c[l] + i_g * g_g
            hn = o_g * jnp.tanh(cn)
            new_h.append(hn)
            new_c.append(cn)
            inp = hn
        h = jnp.stack(new_h)
        c = jnp.stack(new_c)
        htt = h[-1]
        if t != T - 1:
            Hbuf.append(htt)
    Hmat = jax.nn.relu(jnp.stack(Hbuf, axis=1))                       # (B, T-1, Hs)
    wc = params["conv_w"][:, 0, :, 0]                                 # (fn, T-1)
    conv = jnp.einsum('ca,bap->bcp', wc, Hmat) + params["conv_b"][None, :, None]
    conv_vecs = jax.nn.relu(conv.reshape(B, feat, fn))
    w = (htt @ params["lin1_w"].T + params["lin1_b"])[:, None, :]
    s = jnp.sum(conv_vecs * w, axis=2)
    alpha = jax.nn.sigmoid(s)
    v = jnp.sum(alpha[:, :, None] * conv_vecs, axis=1)
    concat = jnp.concatenate([htt, v], axis=1)
    new_ht = concat @ params["lin2_w"].T + params["lin2_b"]
    return new_ht @ params["lin_w"].T + params["lin_b"]


if __name__ == "__main__":
    batch, obs_len = 2, 8
    input_size, output_horizon, hidden_size, n_layers = 1, 4, 32, 2

    key = jax.random.PRNGKey(0)
    kx, kp = jax.random.split(key)
    x = jax.random.normal(kx, (batch, obs_len), dtype=jnp.float32)
    params = init_params(kp, input_size, output_horizon, hidden_size, obs_len, n_layers)

    y = tpalstm_forward(x, params)
    y = jax.block_until_ready(y)

    y_ref = tpalstm_reference(x, params)
    np.testing.assert_allclose(np.asarray(y), np.asarray(y_ref), rtol=2e-3, atol=2e-3)
    print("KERNEL_OK")
</pallas_src>

<mosaic_0001>
module attributes {stable_mosaic.version = 11 : i64} {
  func.func @kernel(%arg0: i32, %arg1: memref<8x2x128xf32, #tpu.memory_space<vmem>>, %arg2: memref<32x128xf32, #tpu.memory_space<vmem>>, %arg3: memref<1x64x128xf32, #tpu.memory_space<vmem>>, %arg4: memref<1x1x128xf32, #tpu.memory_space<vmem>>, %arg5: memref<1x128xf32, #tpu.memory_space<vmem>>, %arg6: memref<1x128xf32, #tpu.memory_space<vmem>>, %arg7: memref<64x14xf32, #tpu.memory_space<vmem>>, %arg8: memref<64x1xf32, #tpu.memory_space<vmem>>, %arg9: memref<64x2xf32, #tpu.memory_space<vmem>>, %arg10: memref<2x64xf32, #tpu.memory_space<vmem>>, %arg11: memref<32x32xf32, #tpu.memory_space<vmem>>, %arg12: memref<1x32xf32, #tpu.memory_space<vmem>>, %arg13: memref<64x32xf32, #tpu.memory_space<vmem>>, %arg14: memref<1x32xf32, #tpu.memory_space<vmem>>, %arg15: memref<32x4xf32, #tpu.memory_space<vmem>>, %arg16: memref<1x4xf32, #tpu.memory_space<vmem>>, %arg17: memref<2x4xf32, #tpu.memory_space<vmem>>, %arg18: memref<16x32xf32, #tpu.memory_space<vmem>>) attributes {dimension_semantics = [#tpu.dimension_semantics<arbitrary>], iteration_bounds = array<i64: 1>, scalar_prefetch = 0 : i64, scratch_operands = 1 : i64, tpu.core_type = #tpu.core_type<tc>, window_params = [{pipeline_mode = #tpu.pipeline_mode<synchronous>, transform_indices = @transform_0, window_bounds = array<i64: 8, 2, 128>}, {pipeline_mode = #tpu.pipeline_mode<synchronous>, transform_indices = @transform_1, window_bounds = array<i64: 32, 128>}, {pipeline_mode = #tpu.pipeline_mode<synchronous>, transform_indices = @transform_2, window_bounds = array<i64: 1, 64, 128>}, {pipeline_mode = #tpu.pipeline_mode<synchronous>, transform_indices = @transform_3, window_bounds = array<i64: 1, 1, 128>}, {pipeline_mode = #tpu.pipeline_mode<synchronous>, transform_indices = @transform_4, window_bounds = array<i64: 1, 128>}, {pipeline_mode = #tpu.pipeline_mode<synchronous>, transform_indices = @transform_5, window_bounds = array<i64: 1, 128>}, {pipeline_mode = #tpu.pipeline_mode<synchronous>, transform_indices = @transform_6, window_bounds = array<i64: 64, 14>}, {pipeline_mode = #tpu.pipeline_mode<synchronous>, transform_indices = @transform_7, window_bounds = array<i64: 64, 1>}, {pipeline_mode = #tpu.pipeline_mode<synchronous>, transform_indices = @transform_8, window_bounds = array<i64: 64, 2>}, {pipeline_mode = #tpu.pipeline_mode<synchronous>, transform_indices = @transform_9, window_bounds = array<i64: 2, 64>}, {pipeline_mode = #tpu.pipeline_mode<synchronous>, transform_indices = @transform_10, window_bounds = array<i64: 32, 32>}, {pipeline_mode = #tpu.pipeline_mode<synchronous>, transform_indices = @transform_11, window_bounds = array<i64: 1, 32>}, {pipeline_mode = #tpu.pipeline_mode<synchronous>, transform_indices = @transform_12, window_bounds = array<i64: 64, 32>}, {pipeline_mode = #tpu.pipeline_mode<synchronous>, transform_indices = @transform_13, window_bounds = array<i64: 1, 32>}, {pipeline_mode = #tpu.pipeline_mode<synchronous>, transform_indices = @transform_14, window_bounds = array<i64: 32, 4>}, {pipeline_mode = #tpu.pipeline_mode<synchronous>, transform_indices = @transform_15, window_bounds = array<i64: 1, 4>}, {pipeline_mode = #tpu.pipeline_mode<synchronous>, transform_indices = @transform_16, window_bounds = array<i64: 2, 4>}]} {
    %c0 = arith.constant 0 : index
    %c0_0 = arith.constant 0 : index
    %0 = vector.load %arg2[%c0, %c0_0] : memref<32x128xf32, #tpu.memory_space<vmem>>, vector<32x128xf32>
    %c0_1 = arith.constant 0 : index
    %c0_2 = arith.constant 0 : index
    %1 = vector.load %arg5[%c0_1, %c0_2] : memref<1x128xf32, #tpu.memory_space<vmem>>, vector<1x128xf32>
    %c0_3 = arith.constant 0 : index
    %c0_4 = arith.constant 0 : index
    %2 = vector.load %arg6[%c0_3, %c0_4] : memref<1x128xf32, #tpu.memory_space<vmem>>, vector<1x128xf32>
    %c0_5 = arith.constant 0 : index
    %c0_6 = arith.constant 0 : index
    %c0_7 = arith.constant 0 : index
    %3 = vector.load %arg3[%c0_5, %c0_6, %c0_7] : memref<1x64x128xf32, #tpu.memory_space<vmem>>, vector<1x64x128xf32>
    %4 = vector.shape_cast %3 : vector<1x64x128xf32> to vector<64x128xf32>
    %c0_8 = arith.constant 0 : index
    %c0_9 = arith.constant 0 : index
    %c0_10 = arith.constant 0 : index
    %5 = vector.load %arg4[%c0_8, %c0_9, %c0_10] : memref<1x1x128xf32, #tpu.memory_space<vmem>>, vector<1x1x128xf32>
    %6 = vector.shape_cast %5 : vector<1x1x128xf32> to vector<1x128xf32>
    %cst = arith.constant 0.000000e+00 : f32
    %7 = vector.broadcast %cst : f32 to vector<2x32xf32>
    %cst_11 = arith.constant 0.000000e+00 : f32
    %8 = vector.broadcast %cst_11 : f32 to vector<2x32xf32>
    %c0_i32 = arith.constant 0 : i32
    %9 = arith.index_cast %c0_i32 : i32 to index
    %c0_12 = arith.constant 0 : index
    %c0_13 = arith.constant 0 : index
    %10 = vector.load %arg1[%9, %c0_12, %c0_13] : memref<8x2x128xf32, #tpu.memory_space<vmem>>, vector<1x2x128xf32>
    %11 = vector.shape_cast %10 : vector<1x2x128xf32> to vector<2x128xf32>
    %cst_14 = arith.constant dense<0.000000e+00> : vector<2x128xf32>
    %12 = tpu.matmul %7, %0, %cst_14 {dimension_numbers = #tpu.dot_dimension_numbers<[1], [0], [0], [1], [0, 0, 1, 1], [], []>} : vector<2x32xf32>, vector<32x128xf32>, vector<2x128xf32> -> vector<2x128xf32>
    %13 = arith.addf %11, %12 : vector<2x128xf32>
    %14 = math.tanh %13 : vector<2x128xf32>
    %15 = vector.broadcast %1 : vector<1x128xf32> to vector<2x128xf32>
    %16 = arith.mulf %14, %15 : vector<2x128xf32>
    %17 = vector.broadcast %2 : vector<1x128xf32> to vector<2x128xf32>
    %18 = arith.addf %16, %17 : vector<2x128xf32>
    %19 = vector.extract_strided_slice %18 {offsets = [0, 0], sizes = [2, 32], strides = [1, 1]} : vector<2x128xf32> to vector<2x32xf32>
    %20 = vector.extract_strided_slice %18 {offsets = [0, 32], sizes = [2, 32], strides = [1, 1]} : vector<2x128xf32> to vector<2x32xf32>
    %21 = vector.extract_strided_slice %18 {offsets = [0, 64], sizes = [2, 32], strides = [1, 1]} : vector<2x128xf32> to vector<2x32xf32>
    %22 = vector.extract_strided_slice %18 {offsets = [0, 96], sizes = [2, 32], strides = [1, 1]} : vector<2x128xf32> to vector<2x32xf32>
    %23 = arith.mulf %20, %7 : vector<2x32xf32>
    %24 = arith.mulf %19, %21 : vector<2x32xf32>
    %25 = arith.addf %23, %24 : vector<2x32xf32>
    %26 = math.tanh %25 : vector<2x32xf32>
    %27 = arith.mulf %22, %26 : vector<2x32xf32>
    %28 = tpu.concatenate %27, %8 in 1 : vector<2x32xf32>, vector<2x32xf32> -> vector<2x64xf32>
    %cst_15 = arith.constant dense<0.000000e+00> : vector<2x128xf32>
    %29 = tpu.matmul %28, %4, %cst_15 {dimension_numbers = #tpu.dot_dimension_numbers<[1], [0], [0], [1], [0, 0, 1, 1], [], []>} : vector<2x64xf32>, vector<64x128xf32>, vector<2x128xf32> -> vector<2x128xf32>
    %30 = vector.broadcast %6 : vector<1x128xf32> to vector<2x128xf32>
    %31 = arith.addf %29, %30 : vector<2x128xf32>
    %32 = math.tanh %31 : vector<2x128xf32>
    %33 = vector.broadcast %1 : vector<1x128xf32> to vector<2x128xf32>
    %34 = arith.mulf %32, %33 : vector<2x128xf32>
    %35 = vector.broadcast %2 : vector<1x128xf32> to vector<2x128xf32>
    %36 = arith.addf %34, %35 : vector<2x128xf32>
    %37 = vector.extract_strided_slice %36 {offsets = [0, 0], sizes = [2, 32], strides = [1, 1]} : vector<2x128xf32> to vector<2x32xf32>
    %38 = vector.extract_strided_slice %36 {offsets = [0, 32], sizes = [2, 32], strides = [1, 1]} : vector<2x128xf32> to vector<2x32xf32>
    %39 = vector.extract_strided_slice %36 {offsets = [0, 64], sizes = [2, 32], strides = [1, 1]} : vector<2x128xf32> to vector<2x32xf32>
    %40 = vector.extract_strided_slice %36 {offsets = [0, 96], sizes = [2, 32], strides = [1, 1]} : vector<2x128xf32> to vector<2x32xf32>
    %41 = arith.mulf %38, %8 : vector<2x32xf32>
    %42 = arith.mulf %37, %39 : vector<2x32xf32>
    %43 = arith.addf %41, %42 : vector<2x32xf32>
    %44 = math.tanh %43 : vector<2x32xf32>
    %45 = arith.mulf %40, %44 : vector<2x32xf32>
    %cst_16 = arith.constant 0.000000e+00 : f32
    %46 = vector.broadcast %cst_16 : f32 to vector<2x32xf32>
    %47 = arith.maximumf %45, %46 : vector<2x32xf32>
    %c2_i32 = arith.constant 2 : i32
    %48 = arith.muli %c0_i32, %c2_i32 : i32
    %49 = arith.index_cast %48 : i32 to index
    %c0_17 = arith.constant 0 : index
    %50 = vector.load %arg18[%49, %c0_17] : memref<16x32xf32, #tpu.memory_space<vmem>>, vector<2x32xf32>
    tpu.vector_store %arg18[%49, %c0_17], %47 {strides = array<i32>} : memref<16x32xf32, #tpu.memory_space<vmem>>, vector<2x32xf32>,
    %c1_i32 = arith.constant 1 : i32
    %51 = arith.index_cast %c1_i32 : i32 to index
    %c0_18 = arith.constant 0 : index
    %c0_19 = arith.constant 0 : index
    %52 = vector.load %arg1[%51, %c0_18, %c0_19] : memref<8x2x128xf32, #tpu.memory_space<vmem>>, vector<1x2x128xf32>
    %53 = vector.shape_cast %52 : vector<1x2x128xf32> to vector<2x128xf32>
    %cst_20 = arith.constant dense<0.000000e+00> : vector<2x128xf32>
    %54 = tpu.matmul %27, %0, %cst_20 {dimension_numbers = #tpu.dot_dimension_numbers<[1], [0], [0], [1], [0, 0, 1, 1], [], []>} : vector<2x32xf32>, vector<32x128xf32>, vector<2x128xf32> -> vector<2x128xf32>
    %55 = arith.addf %53, %54 : vector<2x128xf32>
    %56 = math.tanh %55 : vector<2x128xf32>
    %57 = vector.broadcast %1 : vector<1x128xf32> to vector<2x128xf32>
    %58 = arith.mulf %56, %57 : vector<2x128xf32>
    %59 = vector.broadcast %2 : vector<1x128xf32> to vector<2x128xf32>
    %60 = arith.addf %58, %59 : vector<2x128xf32>
    %61 = vector.extract_strided_slice %60 {offsets = [0, 0], sizes = [2, 32], strides = [1, 1]} : vector<2x128xf32> to vector<2x32xf32>
    %62 = vector.extract_strided_slice %60 {offsets = [0, 32], sizes = [2, 32], strides = [1, 1]} : vector<2x128xf32> to vector<2x32xf32>
    %63 = vector.extract_strided_slice %60 {offsets = [0, 64], sizes = [2, 32], strides = [1, 1]} : vector<2x128xf32> to vector<2x32xf32>
    %64 = vector.extract_strided_slice %60 {offsets = [0, 96], sizes = [2, 32], strides = [1, 1]} : vector<2x128xf32> to vector<2x32xf32>
    %65 = arith.mulf %62, %25 : vector<2x32xf32>
    %66 = arith.mulf %61, %63 : vector<2x32xf32>
    %67 = arith.addf %65, %66 : vector<2x32xf32>
    %68 = math.tanh %67 : vector<2x32xf32>
    %69 = arith.mulf %64, %68 : vector<2x32xf32>
    %70 = tpu.concatenate %69, %45 in 1 : vector<2x32xf32>, vector<2x32xf32> -> vector<2x64xf32>
    %cst_21 = arith.constant dense<0.000000e+00> : vector<2x128xf32>
    %71 = tpu.matmul %70, %4, %cst_21 {dimension_numbers = #tpu.dot_dimension_numbers<[1], [0], [0], [1], [0, 0, 1, 1], [], []>} : vector<2x64xf32>, vector<64x128xf32>, vector<2x128xf32> -> vector<2x128xf32>
    %72 = vector.broadcast %6 : vector<1x128xf32> to vector<2x128xf32>
    %73 = arith.addf %71, %72 : vector<2x128xf32>
    %74 = math.tanh %73 : vector<2x128xf32>
    %75 = vector.broadcast %1 : vector<1x128xf32> to vector<2x128xf32>
    %76 = arith.mulf %74, %75 : vector<2x128xf32>
    %77 = vector.broadcast %2 : vector<1x128xf32> to vector<2x128xf32>
    %78 = arith.addf %76, %77 : vector<2x128xf32>
    %79 = vector.extract_strided_slice %78 {offsets = [0, 0], sizes = [2, 32], strides = [1, 1]} : vector<2x128xf32> to vector<2x32xf32>
    %80 = vector.extract_strided_slice %78 {offsets = [0, 32], sizes = [2, 32], strides = [1, 1]} : vector<2x128xf32> to vector<2x32xf32>
    %81 = vector.extract_strided_slice %78 {offsets = [0, 64], sizes = [2, 32], strides = [1, 1]} : vector<2x128xf32> to vector<2x32xf32>
    %82 = vector.extract_strided_slice %78 {offsets = [0, 96], sizes = [2, 32], strides = [1, 1]} : vector<2x128xf32> to vector<2x32xf32>
    %83 = arith.mulf %80, %43 : vector<2x32xf32>
    %84 = arith.mulf %79, %81 : vector<2x32xf32>
    %85 = arith.addf %83, %84 : vector<2x32xf32>
    %86 = math.tanh %85 : vector<2x32xf32>
    %87 = arith.mulf %82, %86 : vector<2x32xf32>
    %cst_22 = arith.constant 0.000000e+00 : f32
    %88 = vector.broadcast %cst_22 : f32 to vector<2x32xf32>
    %89 = arith.maximumf %87, %88 : vector<2x32xf32>
    %c2_i32_23 = arith.constant 2 : i32
    %90 = arith.muli %c1_i32, %c2_i32_23 : i32
    %91 = arith.index_cast %90 : i32 to index
    %c0_24 = arith.constant 0 : index
    %92 = vector.load %arg18[%91, %c0_24] : memref<16x32xf32, #tpu.memory_space<vmem>>, vector<2x32xf32>
    tpu.vector_store %arg18[%91, %c0_24], %89 {strides = array<i32>} : memref<16x32xf32, #tpu.memory_space<vmem>>, vector<2x32xf32>,
    %c2_i32_25 = arith.constant 2 : i32
    %93 = arith.index_cast %c2_i32_25 : i32 to index
    %c0_26 = arith.constant 0 : index
    %c0_27 = arith.constant 0 : index
    %94 = vector.load %arg1[%93, %c0_26, %c0_27] : memref<8x2x128xf32, #tpu.memory_space<vmem>>, vector<1x2x128xf32>
    %95 = vector.shape_cast %94 : vector<1x2x128xf32> to vector<2x128xf32>
    %cst_28 = arith.constant dense<0.000000e+00> : vector<2x128xf32>
    %96 = tpu.matmul %69, %0, %cst_28 {dimension_numbers = #tpu.dot_dimension_numbers<[1], [0], [0], [1], [0, 0, 1, 1], [], []>} : vector<2x32xf32>, vector<32x128xf32>, vector<2x128xf32> -> vector<2x128xf32>
    %97 = arith.addf %95, %96 : vector<2x128xf32>
    %98 = math.tanh %97 : vector<2x128xf32>
    %99 = vector.broadcast %1 : vector<1x128xf32> to vector<2x128xf32>
    %100 = arith.mulf %98, %99 : vector<2x128xf32>
    %101 = vector.broadcast %2 : vector<1x128xf32> to vector<2x128xf32>
    %102 = arith.addf %100, %101 : vector<2x128xf32>
    %103 = vector.extract_strided_slice %102 {offsets = [0, 0], sizes = [2, 32], strides = [1, 1]} : vector<2x128xf32> to vector<2x32xf32>
    %104 = vector.extract_strided_slice %102 {offsets = [0, 32], sizes = [2, 32], strides = [1, 1]} : vector<2x128xf32> to vector<2x32xf32>
    %105 = vector.extract_strided_slice %102 {offsets = [0, 64], sizes = [2, 32], strides = [1, 1]} : vector<2x128xf32> to vector<2x32xf32>
    %106 = vector.extract_strided_slice %102 {offsets = [0, 96], sizes = [2, 32], strides = [1, 1]} : vector<2x128xf32> to vector<2x32xf32>
    %107 = arith.mulf %104, %67 : vector<2x32xf32>
    %108 = arith.mulf %103, %105 : vector<2x32xf32>
    %109 = arith.addf %107, %108 : vector<2x32xf32>
    %110 = math.tanh %109 : vector<2x32xf32>
    %111 = arith.mulf %106, %110 : vector<2x32xf32>
    %112 = tpu.concatenate %111, %87 in 1 : vector<2x32xf32>, vector<2x32xf32> -> vector<2x64xf32>
    %cst_29 = arith.constant dense<0.000000e+00> : vector<2x128xf32>
    %113 = tpu.matmul %112, %4, %cst_29 {dimension_numbers = #tpu.dot_dimension_numbers<[1], [0], [0], [1], [0, 0, 1, 1], [], []>} : vector<2x64xf32>, vector<64x128xf32>, vector<2x128xf32> -> vector<2x128xf32>
    %114 = vector.broadcast %6 : vector<1x128xf32> to vector<2x128xf32>
    %115 = arith.addf %113, %114 : vector<2x128xf32>
    %116 = math.tanh %115 : vector<2x128xf32>
    %117 = vector.broadcast %1 : vector<1x128xf32> to vector<2x128xf32>
    %118 = arith.mulf %116, %117 : vector<2x128xf32>
    %119 = vector.broadcast %2 : vector<1x128xf32> to vector<2x128xf32>
    %120 = arith.addf %118, %119 : vector<2x128xf32>
    %121 = vector.extract_strided_slice %120 {offsets = [0, 0], sizes = [2, 32], strides = [1, 1]} : vector<2x128xf32> to vector<2x32xf32>
    %122 = vector.extract_strided_slice %120 {offsets = [0, 32], sizes = [2, 32], strides = [1, 1]} : vector<2x128xf32> to vector<2x32xf32>
    %123 = vector.extract_strided_slice %120 {offsets = [0, 64], sizes = [2, 32], strides = [1, 1]} : vector<2x128xf32> to vector<2x32xf32>
    %124 = vector.extract_strided_slice %120 {offsets = [0, 96], sizes = [2, 32], strides = [1, 1]} : vector<2x128xf32> to vector<2x32xf32>
    %125 = arith.mulf %122, %85 : vector<2x32xf32>
    %126 = arith.mulf %121, %123 : vector<2x32xf32>
    %127 = arith.addf %125, %126 : vector<2x32xf32>
    %128 = math.tanh %127 : vector<2x32xf32>
    %129 = arith.mulf %124, %128 : vector<2x32xf32>
    %cst_30 = arith.constant 0.000000e+00 : f32
    %130 = vector.broadcast %cst_30 : f32 to vector<2x32xf32>
    %131 = arith.maximumf %129, %130 : vector<2x32xf32>
    %c2_i32_31 = arith.constant 2 : i32
    %132 = arith.muli %c2_i32_25, %c2_i32_31 : i32
    %133 = arith.index_cast %132 : i32 to index
    %c0_32 = arith.constant 0 : index
    %134 = vector.load %arg18[%133, %c0_32] : memref<16x32xf32, #tpu.memory_space<vmem>>, vector<2x32xf32>
    tpu.vector_store %arg18[%133, %c0_32], %131 {strides = array<i32>} : memref<16x32xf32, #tpu.memory_space<vmem>>, vector<2x32xf32>,
    %c3_i32 = arith.constant 3 : i32
    %135 = arith.index_cast %c3_i32 : i32 to index
    %c0_33 = arith.constant 0 : index
    %c0_34 = arith.constant 0 : index
    %136 = vector.load %arg1[%135, %c0_33, %c0_34] : memref<8x2x128xf32, #tpu.memory_space<vmem>>, vector<1x2x128xf32>
    %137 = vector.shape_cast %136 : vector<1x2x128xf32> to vector<2x128xf32>
    %cst_35 = arith.constant dense<0.000000e+00> : vector<2x128xf32>
    %138 = tpu.matmul %111, %0, %cst_35 {dimension_numbers = #tpu.dot_dimension_numbers<[1], [0], [0], [1], [0, 0, 1, 1], [], []>} : vector<2x32xf32>, vector<32x128xf32>, vector<2x128xf32> -> vector<2x128xf32>
    %139 = arith.addf %137, %138 : vector<2x128xf32>
    %140 = math.tanh %139 : vector<2x128xf32>
    %141 = vector.broadcast %1 : vector<1x128xf32> to vector<2x128xf32>
    %142 = arith.mulf %140, %141 : vector<2x128xf32>
    %143 = vector.broadcast %2 : vector<1x128xf32> to vector<2x128xf32>
    %144 = arith.addf %142, %143 : vector<2x128xf32>
    %145 = vector.extract_strided_slice %144 {offsets = [0, 0], sizes = [2, 32], strides = [1, 1]} : vector<2x128xf32> to vector<2x32xf32>
    %146 = vector.extract_strided_slice %144 {offsets = [0, 32], sizes = [2, 32], strides = [1, 1]} : vector<2x128xf32> to vector<2x32xf32>
    %147 = vector.extract_strided_slice %144 {offsets = [0, 64], sizes = [2, 32], strides = [1, 1]} : vector<2x128xf32> to vector<2x32xf32>
    %148 = vector.extract_strided_slice %144 {offsets = [0, 96], sizes = [2, 32], strides = [1, 1]} : vector<2x128xf32> to vector<2x32xf32>
    %149 = arith.mulf %146, %109 : vector<2x32xf32>
    %150 = arith.mulf %145, %147 : vector<2x32xf32>
    %151 = arith.addf %149, %150 : vector<2x32xf32>
    %152 = math.tanh %151 : vector<2x32xf32>
    %153 = arith.mulf %148, %152 : vector<2x32xf32>
    %154 = tpu.concatenate %153, %129 in 1 : vector<2x32xf32>, vector<2x32xf32> -> vector<2x64xf32>
    %cst_36 = arith.constant dense<0.000000e+00> : vector<2x128xf32>
    %155 = tpu.matmul %154, %4, %cst_36 {dimension_numbers = #tpu.dot_dimension_numbers<[1], [0], [0], [1], [0, 0, 1, 1], [], []>} : vector<2x64xf32>, vector<64x128xf32>, vector<2x128xf32> -> vector<2x128xf32>
    %156 = vector.broadcast %6 : vector<1x128xf32> to vector<2x128xf32>
    %157 = arith.addf %155, %156 : vector<2x128xf32>
    %158 = math.tanh %157 : vector<2x128xf32>
    %159 = vector.broadcast %1 : vector<1x128xf32> to vector<2x128xf32>
    %160 = arith.mulf %158, %159 : vector<2x128xf32>
    %161 = vector.broadcast %2 : vector<1x128xf32> to vector<2x128xf32>
    %162 = arith.addf %160, %161 : vector<2x128xf32>
    %163 = vector.extract_strided_slice %162 {offsets = [0, 0], sizes = [2, 32], strides = [1, 1]} : vector<2x128xf32> to vector<2x32xf32>
    %164 = vector.extract_strided_slice %162 {offsets = [0, 32], sizes = [2, 32], strides = [1, 1]} : vector<2x128xf32> to vector<2x32xf32>
    %165 = vector.extract_strided_slice %162 {offsets = [0, 64], sizes = [2, 32], strides = [1, 1]} : vector<2x128xf32> to vector<2x32xf32>
    %166 = vector.extract_strided_slice %162 {offsets = [0, 96], sizes = [2, 32], strides = [1, 1]} : vector<2x128xf32> to vector<2x32xf32>
    %167 = arith.mulf %164, %127 : vector<2x32xf32>
    %168 = arith.mulf %163, %165 : vector<2x32xf32>
    %169 = arith.addf %167, %168 : vector<2x32xf32>
    %170 = math.tanh %169 : vector<2x32xf32>
    %171 = arith.mulf %166, %170 : vector<2x32xf32>
    %cst_37 = arith.constant 0.000000e+00 : f32
    %172 = vector.broadcast %cst_37 : f32 to vector<2x32xf32>
    %173 = arith.maximumf %171, %172 : vector<2x32xf32>
    %c2_i32_38 = arith.constant 2 : i32
    %174 = arith.muli %c3_i32, %c2_i32_38 : i32
    %175 = arith.index_cast %174 : i32 to index
    %c0_39 = arith.constant 0 : index
    %176 = vector.load %arg18[%175, %c0_39] : memref<16x32xf32, #tpu.memory_space<vmem>>, vector<2x32xf32>
    tpu.vector_store %arg18[%175, %c0_39], %173 {strides = array<i32>} : memref<16x32xf32, #tpu.memory_space<vmem>>, vector<2x32xf32>,
    %c4_i32 = arith.constant 4 : i32
    %177 = arith.index_cast %c4_i32 : i32 to index
    %c0_40 = arith.constant 0 : index
    %c0_41 = arith.constant 0 : index
    %178 = vector.load %arg1[%177, %c0_40, %c0_41] : memref<8x2x128xf32, #tpu.memory_space<vmem>>, vector<1x2x128xf32>
    %179 = vector.shape_cast %178 : vector<1x2x128xf32> to vector<2x128xf32>
    %cst_42 = arith.constant dense<0.000000e+00> : vector<2x128xf32>
    %180 = tpu.matmul %153, %0, %cst_42 {dimension_numbers = #tpu.dot_dimension_numbers<[1], [0], [0], [1], [0, 0, 1, 1], [], []>} : vector<2x32xf32>, vector<32x128xf32>, vector<2x128xf32> -> vector<2x128xf32>
    %181 = arith.addf %179, %180 : vector<2x128xf32>
    %182 = math.tanh %181 : vector<2x128xf32>
    %183 = vector.broadcast %1 : vector<1x128xf32> to vector<2x128xf32>
    %184 = arith.mulf %182, %183 : vector<2x128xf32>
    %185 = vector.broadcast %2 : vector<1x128xf32> to vector<2x128xf32>
    %186 = arith.addf %184, %185 : vector<2x128xf32>
    %187 = vector.extract_strided_slice %186 {offsets = [0, 0], sizes = [2, 32], strides = [1, 1]} : vector<2x128xf32> to vector<2x32xf32>
    %188 = vector.extract_strided_slice %186 {offsets = [0, 32], sizes = [2, 32], strides = [1, 1]} : vector<2x128xf32> to vector<2x32xf32>
    %189 = vector.extract_strided_slice %186 {offsets = [0, 64], sizes = [2, 32], strides = [1, 1]} : vector<2x128xf32> to vector<2x32xf32>
    %190 = vector.extract_strided_slice %186 {offsets = [0, 96], sizes = [2, 32], strides = [1, 1]} : vector<2x128xf32> to vector<2x32xf32>
    %191 = arith.mulf %188, %151 : vector<2x32xf32>
    %192 = arith.mulf %187, %189 : vector<2x32xf32>
    %193 = arith.addf %191, %192 : vector<2x32xf32>
    %194 = math.tanh %193 : vector<2x32xf32>
    %195 = arith.mulf %190, %194 : vector<2x32xf32>
    %196 = tpu.concatenate %195, %171 in 1 : vector<2x32xf32>, vector<2x32xf32> -> vector<2x64xf32>
    %cst_43 = arith.constant dense<0.000000e+00> : vector<2x128xf32>
    %197 = tpu.matmul %196, %4, %cst_43 {dimension_numbers = #tpu.dot_dimension_numbers<[1], [0], [0], [1], [0, 0, 1, 1], [], []>} : vector<2x64xf32>, vector<64x128xf32>, vector<2x128xf32> -> vector<2x128xf32>
    %198 = vector.broadcast %6 : vector<1x128xf32> to vector<2x128xf32>
    %199 = arith.addf %197, %198 : vector<2x128xf32>
    %200 = math.tanh %199 : vector<2x128xf32>
    %201 = vector.broadcast %1 : vector<1x128xf32> to vector<2x128xf32>
    %202 = arith.mulf %200, %201 : vector<2x128xf32>
    %203 = vector.broadcast %2 : vector<1x128xf32> to vector<2x128xf32>
    %204 = arith.addf %202, %203 : vector<2x128xf32>
    %205 = vector.extract_strided_slice %204 {offsets = [0, 0], sizes = [2, 32], strides = [1, 1]} : vector<2x128xf32> to vector<2x32xf32>
    %206 = vector.extract_strided_slice %204 {offsets = [0, 32], sizes = [2, 32], strides = [1, 1]} : vector<2x128xf32> to vector<2x32xf32>
    %207 = vector.extract_strided_slice %204 {offsets = [0, 64], sizes = [2, 32], strides = [1, 1]} : vector<2x128xf32> to vector<2x32xf32>
    %208 = vector.extract_strided_slice %204 {offsets = [0, 96], sizes = [2, 32], strides = [1, 1]} : vector<2x128xf32> to vector<2x32xf32>
    %209 = arith.mulf %206, %169 : vector<2x32xf32>
    %210 = arith.mulf %205, %207 : vector<2x32xf32>
    %211 = arith.addf %209, %210 : vector<2x32xf32>
    %212 = math.tanh %211 : vector<2x32xf32>
    %213 = arith.mulf %208, %212 : vector<2x32xf32>
    %cst_44 = arith.constant 0.000000e+00 : f32
    %214 = vector.broadcast %cst_44 : f32 to vector<2x32xf32>
    %215 = arith.maximumf %213, %214 : vector<2x32xf32>
    %c2_i32_45 = arith.constant 2 : i32
    %216 = arith.muli %c4_i32, %c2_i32_45 : i32
    %217 = arith.index_cast %216 : i32 to index
    %c0_46 = arith.constant 0 : index
    %218 = vector.load %arg18[%217, %c0_46] : memref<16x32xf32, #tpu.memory_space<vmem>>, vector<2x32xf32>
    tpu.vector_store %arg18[%217, %c0_46], %215 {strides = array<i32>} : memref<16x32xf32, #tpu.memory_space<vmem>>, vector<2x32xf32>,
    %c5_i32 = arith.constant 5 : i32
    %219 = arith.index_cast %c5_i32 : i32 to index
    %c0_47 = arith.constant 0 : index
    %c0_48 = arith.constant 0 : index
    %220 = vector.load %arg1[%219, %c0_47, %c0_48] : memref<8x2x128xf32, #tpu.memory_space<vmem>>, vector<1x2x128xf32>
    %221 = vector.shape_cast %220 : vector<1x2x128xf32> to vector<2x128xf32>
    %cst_49 = arith.constant dense<0.000000e+00> : vector<2x128xf32>
    %222 = tpu.matmul %195, %0, %cst_49 {dimension_numbers = #tpu.dot_dimension_numbers<[1], [0], [0], [1], [0, 0, 1, 1], [], []>} : vector<2x32xf32>, vector<32x128xf32>, vector<2x128xf32> -> vector<2x128xf32>
    %223 = arith.addf %221, %222 : vector<2x128xf32>
    %224 = math.tanh %223 : vector<2x128xf32>
    %225 = vector.broadcast %1 : vector<1x128xf32> to vector<2x128xf32>
    %226 = arith.mulf %224, %225 : vector<2x128xf32>
    %227 = vector.broadcast %2 : vector<1x128xf32> to vector<2x128xf32>
    %228 = arith.addf %226, %227 : vector<2x128xf32>
    %229 = vector.extract_strided_slice %228 {offsets = [0, 0], sizes = [2, 32], strides = [1, 1]} : vector<2x128xf32> to vector<2x32xf32>
    %230 = vector.extract_strided_slice %228 {offsets = [0, 32], sizes = [2, 32], strides = [1, 1]} : vector<2x128xf32> to vector<2x32xf32>
    %231 = vector.extract_strided_slice %228 {offsets = [0, 64], sizes = [2, 32], strides = [1, 1]} : vector<2x128xf32> to vector<2x32xf32>
    %232 = vector.extract_strided_slice %228 {offsets = [0, 96], sizes = [2, 32], strides = [1, 1]} : vector<2x128xf32> to vector<2x32xf32>
    %233 = arith.mulf %230, %193 : vector<2x32xf32>
    %234 = arith.mulf %229, %231 : vector<2x32xf32>
    %235 = arith.addf %233, %234 : vector<2x32xf32>
    %236 = math.tanh %235 : vector<2x32xf32>
    %237 = arith.mulf %232, %236 : vector<2x32xf32>
    %238 = tpu.concatenate %237, %213 in 1 : vector<2x32xf32>, vector<2x32xf32> -> vector<2x64xf32>
    %cst_50 = arith.constant dense<0.000000e+00> : vector<2x128xf32>
    %239 = tpu.matmul %238, %4, %cst_50 {dimension_numbers = #tpu.dot_dimension_numbers<[1], [0], [0], [1], [0, 0, 1, 1], [], []>} : vector<2x64xf32>, vector<64x128xf32>, vector<2x128xf32> -> vector<2x128xf32>
    %240 = vector.broadcast %6 : vector<1x128xf32> to vector<2x128xf32>
    %241 = arith.addf %239, %240 : vector<2x128xf32>
    %242 = math.tanh %241 : vector<2x128xf32>
    %243 = vector.broadcast %1 : vector<1x128xf32> to vector<2x128xf32>
    %244 = arith.mulf %242, %243 : vector<2x128xf32>
    %245 = vector.broadcast %2 : vector<1x128xf32> to vector<2x128xf32>
    %246 = arith.addf %244, %245 : vector<2x128xf32>
    %247 = vector.extract_strided_slice %246 {offsets = [0, 0], sizes = [2, 32], strides = [1, 1]} : vector<2x128xf32> to vector<2x32xf32>
    %248 = vector.extract_strided_slice %246 {offsets = [0, 32], sizes = [2, 32], strides = [1, 1]} : vector<2x128xf32> to vector<2x32xf32>
    %249 = vector.extract_strided_slice %246 {offsets = [0, 64], sizes = [2, 32], strides = [1, 1]} : vector<2x128xf32> to vector<2x32xf32>
    %250 = vector.extract_strided_slice %246 {offsets = [0, 96], sizes = [2, 32], strides = [1, 1]} : vector<2x128xf32> to vector<2x32xf32>
    %251 = arith.mulf %248, %211 : vector<2x32xf32>
    %252 = arith.mulf %247, %249 : vector<2x32xf32>
    %253 = arith.addf %251, %252 : vector<2x32xf32>
    %254 = math.tanh %253 : vector<2x32xf32>
    %255 = arith.mulf %250, %254 : vector<2x32xf32>
    %cst_51 = arith.constant 0.000000e+00 : f32
    %256 = vector.broadcast %cst_51 : f32 to vector<2x32xf32>
    %257 = arith.maximumf %255, %256 : vector<2x32xf32>
    %c2_i32_52 = arith.constant 2 : i32
    %258 = arith.muli %c5_i32, %c2_i32_52 : i32
    %259 = arith.index_cast %258 : i32 to index
    %c0_53 = arith.constant 0 : index
    %260 = vector.load %arg18[%259, %c0_53] : memref<16x32xf32, #tpu.memory_space<vmem>>, vector<2x32xf32>
    tpu.vector_store %arg18[%259, %c0_53], %257 {strides = array<i32>} : memref<16x32xf32, #tpu.memory_space<vmem>>, vector<2x32xf32>,
    %c6_i32 = arith.constant 6 : i32
    %261 = arith.index_cast %c6_i32 : i32 to index
    %c0_54 = arith.constant 0 : index
    %c0_55 = arith.constant 0 : index
    %262 = vector.load %arg1[%261, %c0_54, %c0_55] : memref<8x2x128xf32, #tpu.memory_space<vmem>>, vector<1x2x128xf32>
    %263 = vector.shape_cast %262 : vector<1x2x128xf32> to vector<2x128xf32>
    %cst_56 = arith.constant dense<0.000000e+00> : vector<2x128xf32>
    %264 = tpu.matmul %237, %0, %cst_56 {dimension_numbers = #tpu.dot_dimension_numbers<[1], [0], [0], [1], [0, 0, 1, 1], [], []>} : vector<2x32xf32>, vector<32x128xf32>, vector<2x128xf32> -> vector<2x128xf32>
    %265 = arith.addf %263, %264 : vector<2x128xf32>
    %266 = math.tanh %265 : vector<2x128xf32>
    %267 = vector.broadcast %1 : vector<1x128xf32> to vector<2x128xf32>
    %268 = arith.mulf %266, %267 : vector<2x128xf32>
    %269 = vector.broadcast %2 : vector<1x128xf32> to vector<2x128xf32>
    %270 = arith.addf %268, %269 : vector<2x128xf32>
    %271 = vector.extract_strided_slice %270 {offsets = [0, 0], sizes = [2, 32], strides = [1, 1]} : vector<2x128xf32> to vector<2x32xf32>
    %272 = vector.extract_strided_slice %270 {offsets = [0, 32], sizes = [2, 32], strides = [1, 1]} : vector<2x128xf32> to vector<2x32xf32>
    %273 = vector.extract_strided_slice %270 {offsets = [0, 64], sizes = [2, 32], strides = [1, 1]} : vector<2x128xf32> to vector<2x32xf32>
    %274 = vector.extract_strided_slice %270 {offsets = [0, 96], sizes = [2, 32], strides = [1, 1]} : vector<2x128xf32> to vector<2x32xf32>
    %275 = arith.mulf %272, %235 : vector<2x32xf32>
    %276 = arith.mulf %271, %273 : vector<2x32xf32>
    %277 = arith.addf %275, %276 : vector<2x32xf32>
    %278 = math.tanh %277 : vector<2x32xf32>
    %279 = arith.mulf %274, %278 : vector<2x32xf32>
    %280 = tpu.concatenate %279, %255 in 1 : vector<2x32xf32>, vector<2x32xf32> -> vector<2x64xf32>
    %cst_57 = arith.constant dense<0.000000e+00> : vector<2x128xf32>
    %281 = tpu.matmul %280, %4, %cst_57 {dimension_numbers = #tpu.dot_dimension_numbers<[1], [0], [0], [1], [0, 0, 1, 1], [], []>} : vector<2x64xf32>, vector<64x128xf32>, vector<2x128xf32> -> vector<2x128xf32>
    %282 = vector.broadcast %6 : vector<1x128xf32> to vector<2x128xf32>
    %283 = arith.addf %281, %282 : vector<2x128xf32>
    %284 = math.tanh %283 : vector<2x128xf32>
    %285 = vector.broadcast %1 : vector<1x128xf32> to vector<2x128xf32>
    %286 = arith.mulf %284, %285 : vector<2x128xf32>
    %287 = vector.broadcast %2 : vector<1x128xf32> to vector<2x128xf32>
    %288 = arith.addf %286, %287 : vector<2x128xf32>
    %289 = vector.extract_strided_slice %288 {offsets = [0, 0], sizes = [2, 32], strides = [1, 1]} : vector<2x128xf32> to vector<2x32xf32>
    %290 = vector.extract_strided_slice %288 {offsets = [0, 32], sizes = [2, 32], strides = [1, 1]} : vector<2x128xf32> to vector<2x32xf32>
    %291 = vector.extract_strided_slice %288 {offsets = [0, 64], sizes = [2, 32], strides = [1, 1]} : vector<2x128xf32> to vector<2x32xf32>
    %292 = vector.extract_strided_slice %288 {offsets = [0, 96], sizes = [2, 32], strides = [1, 1]} : vector<2x128xf32> to vector<2x32xf32>
    %293 = arith.mulf %290, %253 : vector<2x32xf32>
    %294 = arith.mulf %289, %291 : vector<2x32xf32>
    %295 = arith.addf %293, %294 : vector<2x32xf32>
    %296 = math.tanh %295 : vector<2x32xf32>
    %297 = arith.mulf %292, %296 : vector<2x32xf32>
    %cst_58 = arith.constant 0.000000e+00 : f32
    %298 = vector.broadcast %cst_58 : f32 to vector<2x32xf32>
    %299 = arith.maximumf %297, %298 : vector<2x32xf32>
    %c2_i32_59 = arith.constant 2 : i32
    %300 = arith.muli %c6_i32, %c2_i32_59 : i32
    %301 = arith.index_cast %300 : i32 to index
    %c0_60 = arith.constant 0 : index
    %302 = vector.load %arg18[%301, %c0_60] : memref<16x32xf32, #tpu.memory_space<vmem>>, vector<2x32xf32>
    tpu.vector_store %arg18[%301, %c0_60], %299 {strides = array<i32>} : memref<16x32xf32, #tpu.memory_space<vmem>>, vector<2x32xf32>,
    %c7_i32 = arith.constant 7 : i32
    %303 = arith.index_cast %c7_i32 : i32 to index
    %c0_61 = arith.constant 0 : index
    %c0_62 = arith.constant 0 : index
    %304 = vector.load %arg1[%303, %c0_61, %c0_62] : memref<8x2x128xf32, #tpu.memory_space<vmem>>, vector<1x2x128xf32>
    %305 = vector.shape_cast %304 : vector<1x2x128xf32> to vector<2x128xf32>
    %cst_63 = arith.constant dense<0.000000e+00> : vector<2x128xf32>
    %306 = tpu.matmul %279, %0, %cst_63 {dimension_numbers = #tpu.dot_dimension_numbers<[1], [0], [0], [1], [0, 0, 1, 1], [], []>} : vector<2x32xf32>, vector<32x128xf32>, vector<2x128xf32> -> vector<2x128xf32>
    %307 = arith.addf %305, %306 : vector<2x128xf32>
    %308 = math.tanh %307 : vector<2x128xf32>
    %309 = vector.broadcast %1 : vector<1x128xf32> to vector<2x128xf32>
    %310 = arith.mulf %308, %309 : vector<2x128xf32>
    %311 = vector.broadcast %2 : vector<1x128xf32> to vector<2x128xf32>
    %312 = arith.addf %310, %311 : vector<2x128xf32>
    %313 = vector.extract_strided_slice %312 {offsets = [0, 0], sizes = [2, 32], strides = [1, 1]} : vector<2x128xf32> to vector<2x32xf32>
    %314 = vector.extract_strided_slice %312 {offsets = [0, 32], sizes = [2, 32], strides = [1, 1]} : vector<2x128xf32> to vector<2x32xf32>
    %315 = vector.extract_strided_slice %312 {offsets = [0, 64], sizes = [2, 32], strides = [1, 1]} : vector<2x128xf32> to vector<2x32xf32>
    %316 = vector.extract_strided_slice %312 {offsets = [0, 96], sizes = [2, 32], strides = [1, 1]} : vector<2x128xf32> to vector<2x32xf32>
    %317 = arith.mulf %314, %277 : vector<2x32xf32>
    %318 = arith.mulf %313, %315 : vector<2x32xf32>
    %319 = arith.addf %317, %318 : vector<2x32xf32>
    %320 = math.tanh %319 : vector<2x32xf32>
    %321 = arith.mulf %316, %320 : vector<2x32xf32>
    %322 = tpu.concatenate %321, %297 in 1 : vector<2x32xf32>, vector<2x32xf32> -> vector<2x64xf32>
    %cst_64 = arith.constant dense<0.000000e+00> : vector<2x128xf32>
    %323 = tpu.matmul %322, %4, %cst_64 {dimension_numbers = #tpu.dot_dimension_numbers<[1], [0], [0], [1], [0, 0, 1, 1], [], []>} : vector<2x64xf32>, vector<64x128xf32>, vector<2x128xf32> -> vector<2x128xf32>
    %324 = vector.broadcast %6 : vector<1x128xf32> to vector<2x128xf32>
    %325 = arith.addf %323, %324 : vector<2x128xf32>
    %326 = math.tanh %325 : vector<2x128xf32>
    %327 = vector.broadcast %1 : vector<1x128xf32> to vector<2x128xf32>
    %328 = arith.mulf %326, %327 : vector<2x128xf32>
    %329 = vector.broadcast %2 : vector<1x128xf32> to vector<2x128xf32>
    %330 = arith.addf %328, %329 : vector<2x128xf32>
    %331 = vector.extract_strided_slice %330 {offsets = [0, 0], sizes = [2, 32], strides = [1, 1]} : vector<2x128xf32> to vector<2x32xf32>
    %332 = vector.extract_strided_slice %330 {offsets = [0, 32], sizes = [2, 32], strides = [1, 1]} : vector<2x128xf32> to vector<2x32xf32>
    %333 = vector.extract_strided_slice %330 {offsets = [0, 64], sizes = [2, 32], strides = [1, 1]} : vector<2x128xf32> to vector<2x32xf32>
    %334 = vector.extract_strided_slice %330 {offsets = [0, 96], sizes = [2, 32], strides = [1, 1]} : vector<2x128xf32> to vector<2x32xf32>
    %335 = arith.mulf %332, %295 : vector<2x32xf32>
    %336 = arith.mulf %331, %333 : vector<2x32xf32>
    %337 = arith.addf %335, %336 : vector<2x32xf32>
    %338 = math.tanh %337 : vector<2x32xf32>
    %339 = arith.mulf %334, %338 : vector<2x32xf32>
    %cst_65 = arith.constant 0.000000e+00 : f32
    %340 = vector.broadcast %cst_65 : f32 to vector<2x32xf32>
    %341 = arith.maximumf %339, %340 : vector<2x32xf32>
    %c2_i32_66 = arith.constant 2 : i32
    %342 = arith.muli %c7_i32, %c2_i32_66 : i32
    %343 = arith.index_cast %342 : i32 to index
    %c0_67 = arith.constant 0 : index
    %344 = vector.load %arg18[%343, %c0_67] : memref<16x32xf32, #tpu.memory_space<vmem>>, vector<2x32xf32>
    tpu.vector_store %arg18[%343, %c0_67], %341 {strides = array<i32>} : memref<16x32xf32, #tpu.memory_space<vmem>>, vector<2x32xf32>,
    %c8_i32 = arith.constant 8 : i32
    %c0_68 = arith.constant 0 : index
    %c0_69 = arith.constant 0 : index
    %345 = vector.load %arg18[%c0_68, %c0_69] : memref<16x32xf32, #tpu.memory_space<vmem>>, vector<14x32xf32>
    %c0_70 = arith.constant 0 : index
    %c0_71 = arith.constant 0 : index
    %346 = vector.load %arg7[%c0_70, %c0_71] : memref<64x14xf32, #tpu.memory_space<vmem>>, vector<64x14xf32>
    %cst_72 = arith.constant dense<0.000000e+00> : vector<64x32xf32>
    %347 = tpu.matmul %346, %345, %cst_72 {dimension_numbers = #tpu.dot_dimension_numbers<[1], [0], [0], [1], [0, 0, 1, 1], [], []>} : vector<64x14xf32>, vector<14x32xf32>, vector<64x32xf32> -> vector<64x32xf32>
    %c0_73 = arith.constant 0 : index
    %c0_74 = arith.constant 0 : index
    %348 = vector.load %arg8[%c0_73, %c0_74] : memref<64x1xf32, #tpu.memory_space<vmem>>, vector<64x1xf32>
    %349 = vector.broadcast %348 : vector<64x1xf32> to vector<64x32xf32>
    %350 = arith.addf %347, %349 : vector<64x32xf32>
    %cst_75 = arith.constant 0.000000e+00 : f32
    %351 = vector.broadcast %cst_75 : f32 to vector<64x32xf32>
    %352 = arith.maximumf %350, %351 : vector<64x32xf32>
    %c0_76 = arith.constant 0 : index
    %c0_77 = arith.constant 0 : index
    %353 = vector.load %arg11[%c0_76, %c0_77] : memref<32x32xf32, #tpu.memory_space<vmem>>, vector<32x32xf32>
    %cst_78 = arith.constant dense<0.000000e+00> : vector<2x32xf32>
    %354 = tpu.matmul %339, %353, %cst_78 {dimension_numbers = #tpu.dot_dimension_numbers<[1], [0], [0], [1], [0, 0, 1, 1], [], []>} : vector<2x32xf32>, vector<32x32xf32>, vector<2x32xf32> -> vector<2x32xf32>
    %c0_79 = arith.constant 0 : index
    %c0_80 = arith.constant 0 : index
    %355 = vector.load %arg12[%c0_79, %c0_80] : memref<1x32xf32, #tpu.memory_space<vmem>>, vector<1x32xf32>
    %356 = vector.broadcast %355 : vector<1x32xf32> to vector<2x32xf32>
    %357 = arith.addf %354, %356 : vector<2x32xf32>
    %c0_81 = arith.constant 0 : index
    %c0_82 = arith.constant 0 : index
    %358 = vector.load %arg9[%c0_81, %c0_82] : memref<64x2xf32, #tpu.memory_space<vmem>>, vector<64x2xf32>
    %cst_83 = arith.constant dense<0.000000e+00> : vector<64x32xf32>
    %359 = tpu.matmul %358, %357, %cst_83 {dimension_numbers = #tpu.dot_dimension_numbers<[1], [0], [0], [1], [0, 0, 1, 1], [], []>} : vector<64x2xf32>, vector<2x32xf32>, vector<64x32xf32> -> vector<64x32xf32>
    %360 = arith.mulf %352, %359 : vector<64x32xf32>
    %cst_84 = arith.constant dense<0.000000e+00> : vector<64xf32>
    %361 = vector.multi_reduction <add>, %360, %cst_84 [1] : vector<64x32xf32> to vector<64xf32>
    %362 = vector.shape_cast %361 : vector<64xf32> to vector<64x1xf32>
    %cst_85 = arith.constant 5.000000e-01 : f32
    %363 = vector.broadcast %cst_85 : f32 to vector<64x1xf32>
    %364 = arith.mulf %363, %362 : vector<64x1xf32>
    %365 = math.tanh %364 : vector<64x1xf32>
    %cst_86 = arith.constant 5.000000e-01 : f32
    %366 = vector.broadcast %cst_86 : f32 to vector<64x1xf32>
    %367 = arith.mulf %366, %365 : vector<64x1xf32>
    %cst_87 = arith.constant 5.000000e-01 : f32
    %368 = vector.broadcast %cst_87 : f32 to vector<64x1xf32>
    %369 = arith.addf %367, %368 : vector<64x1xf32>
    %c0_88 = arith.constant 0 : index
    %c0_89 = arith.constant 0 : index
    %370 = vector.load %arg10[%c0_88, %c0_89] : memref<2x64xf32, #tpu.memory_space<vmem>>, vector<2x64xf32>
    %371 = vector.broadcast %369 : vector<64x1xf32> to vector<64x32xf32>
    %372 = arith.mulf %371, %352 : vector<64x32xf32>
    %cst_90 = arith.constant dense<0.000000e+00> : vector<2x32xf32>
    %373 = tpu.matmul %370, %372, %cst_90 {dimension_numbers = #tpu.dot_dimension_numbers<[1], [0], [0], [1], [0, 0, 1, 1], [], []>} : vector<2x64xf32>, vector<64x32xf32>, vector<2x32xf32> -> vector<2x32xf32>
    %374 = tpu.concatenate %339, %373 in 1 : vector<2x32xf32>, vector<2x32xf32> -> vector<2x64xf32>
    %c0_91 = arith.constant 0 : index
    %c0_92 = arith.constant 0 : index
    %375 = vector.load %arg13[%c0_91, %c0_92] : memref<64x32xf32, #tpu.memory_space<vmem>>, vector<64x32xf32>
    %cst_93 = arith.constant dense<0.000000e+00> : vector<2x32xf32>
    %376 = tpu.matmul %374, %375, %cst_93 {dimension_numbers = #tpu.dot_dimension_numbers<[1], [0], [0], [1], [0, 0, 1, 1], [], []>} : vector<2x64xf32>, vector<64x32xf32>, vector<2x32xf32> -> vector<2x32xf32>
    %c0_94 = arith.constant 0 : index
    %c0_95 = arith.constant 0 : index
    %377 = vector.load %arg14[%c0_94, %c0_95] : memref<1x32xf32, #tpu.memory_space<vmem>>, vector<1x32xf32>
    %378 = vector.broadcast %377 : vector<1x32xf32> to vector<2x32xf32>
    %379 = arith.addf %376, %378 : vector<2x32xf32>
    %c0_96 = arith.constant 0 : index
    %c0_97 = arith.constant 0 : index
    %380 = vector.load %arg15[%c0_96, %c0_97] : memref<32x4xf32, #tpu.memory_space<vmem>>, vector<32x4xf32>
    %cst_98 = arith.constant dense<0.000000e+00> : vector<2x4xf32>
    %381 = tpu.matmul %379, %380, %cst_98 {dimension_numbers = #tpu.dot_dimension_numbers<[1], [0], [0], [1], [0, 0, 1, 1], [], []>} : vector<2x32xf32>, vector<32x4xf32>, vector<2x4xf32> -> vector<2x4xf32>
    %c0_99 = arith.constant 0 : index
    %c0_100 = arith.constant 0 : index
    %382 = vector.load %arg16[%c0_99, %c0_100] : memref<1x4xf32, #tpu.memory_space<vmem>>, vector<1x4xf32>
    %383 = vector.broadcast %382 : vector<1x4xf32> to vector<2x4xf32>
    %384 = arith.addf %381, %383 : vector<2x4xf32>
    %c0_101 = arith.constant 0 : index
    %c0_102 = arith.constant 0 : index
    %385 = vector.load %arg17[%c0_101, %c0_102] : memref<2x4xf32, #tpu.memory_space<vmem>>, vector<2x4xf32>
    tpu.vector_store %arg17[%c0_101, %c0_102], %384 {strides = array<i32>} : memref<2x4xf32, #tpu.memory_space<vmem>>, vector<2x4xf32>,
    return
  }
  func.func @transform_0(%arg0: i32) -> (i32, i32, i32) {
    %c0_i32 = arith.constant 0 : i32
    %c0_i32_0 = arith.constant 0 : i32
    %c0_i32_1 = arith.constant 0 : i32
    %c0_i32_2 = arith.constant 0 : i32
    return %c0_i32, %c0_i32_0, %c0_i32_1 : i32, i32, i32
  }
  func.func @transform_1(%arg0: i32) -> (i32, i32) {
    %c0_i32 = arith.constant 0 : i32
    %c0_i32_0 = arith.constant 0 : i32
    %c0_i32_1 = arith.constant 0 : i32
    return %c0_i32, %c0_i32_0 : i32, i32
  }
  func.func @transform_2(%arg0: i32) -> (i32, i32, i32) {
    %c0_i32 = arith.constant 0 : i32
    %c0_i32_0 = arith.constant 0 : i32
    %c0_i32_1 = arith.constant 0 : i32
    %c0_i32_2 = arith.constant 0 : i32
    return %c0_i32, %c0_i32_0, %c0_i32_1 : i32, i32, i32
  }
  func.func @transform_3(%arg0: i32) -> (i32, i32, i32) {
    %c0_i32 = arith.constant 0 : i32
    %c0_i32_0 = arith.constant 0 : i32
    %c0_i32_1 = arith.constant 0 : i32
    %c0_i32_2 = arith.constant 0 : i32
    return %c0_i32, %c0_i32_0, %c0_i32_1 : i32, i32, i32
  }
  func.func @transform_4(%arg0: i32) -> (i32, i32) {
    %c0_i32 = arith.constant 0 : i32
    %c0_i32_0 = arith.constant 0 : i32
    %c0_i32_1 = arith.constant 0 : i32
    return %c0_i32, %c0_i32_0 : i32, i32
  }
  func.func @transform_5(%arg0: i32) -> (i32, i32) {
    %c0_i32 = arith.constant 0 : i32
    %c0_i32_0 = arith.constant 0 : i32
    %c0_i32_1 = arith.constant 0 : i32
    return %c0_i32, %c0_i32_0 : i32, i32
  }
  func.func @transform_6(%arg0: i32) -> (i32, i32) {
    %c0_i32 = arith.constant 0 : i32
    %c0_i32_0 = arith.constant 0 : i32
    %c0_i32_1 = arith.constant 0 : i32
    return %c0_i32, %c0_i32_0 : i32, i32
  }
  func.func @transform_7(%arg0: i32) -> (i32, i32) {
    %c0_i32 = arith.constant 0 : i32
    %c0_i32_0 = arith.constant 0 : i32
    %c0_i32_1 = arith.constant 0 : i32
    return %c0_i32, %c0_i32_0 : i32, i32
  }
  func.func @transform_8(%arg0: i32) -> (i32, i32) {
    %c0_i32 = arith.constant 0 : i32
    %c0_i32_0 = arith.constant 0 : i32
    %c0_i32_1 = arith.constant 0 : i32
    return %c0_i32, %c0_i32_0 : i32, i32
  }
  func.func @transform_9(%arg0: i32) -> (i32, i32) {
    %c0_i32 = arith.constant 0 : i32
    %c0_i32_0 = arith.constant 0 : i32
    %c0_i32_1 = arith.constant 0 : i32
    return %c0_i32, %c0_i32_0 : i32, i32
  }
  func.func @transform_10(%arg0: i32) -> (i32, i32) {
    %c0_i32 = arith.constant 0 : i32
    %c0_i32_0 = arith.constant 0 : i32
    %c0_i32_1 = arith.constant 0 : i32
    return %c0_i32, %c0_i32_0 : i32, i32
  }
  func.func @transform_11(%arg0: i32) -> (i32, i32) {
    %c0_i32 = arith.constant 0 : i32
    %c0_i32_0 = arith.constant 0 : i32
    %c0_i32_1 = arith.constant 0 : i32
    return %c0_i32, %c0_i32_0 : i32, i32
  }
  func.func @transform_12(%arg0: i32) -> (i32, i32) {
    %c0_i32 = arith.constant 0 : i32
    %c0_i32_0 = arith.constant 0 : i32
    %c0_i32_1 = arith.constant 0 : i32
    return %c0_i32, %c0_i32_0 : i32, i32
  }
  func.func @transform_13(%arg0: i32) -> (i32, i32) {
    %c0_i32 = arith.constant 0 : i32
    %c0_i32_0 = arith.constant 0 : i32
    %c0_i32_1 = arith.constant 0 : i32
    return %c0_i32, %c0_i32_0 : i32, i32
  }
  func.func @transform_14(%arg0: i32) -> (i32, i32) {
    %c0_i32 = arith.constant 0 : i32
    %c0_i32_0 = arith.constant 0 : i32
    %c0_i32_1 = arith.constant 0 : i32
    return %c0_i32, %c0_i32_0 : i32, i32
  }
  func.func @transform_15(%arg0: i32) -> (i32, i32) {
    %c0_i32 = arith.constant 0 : i32
    %c0_i32_0 = arith.constant 0 : i32
    %c0_i32_1 = arith.constant 0 : i32
    return %c0_i32, %c0_i32_0 : i32, i32
  }
  func.func @transform_16(%arg0: i32) -> (i32, i32) {
    %c0_i32 = arith.constant 0 : i32
    %c0_i32_0 = arith.constant 0 : i32
    %c0_i32_1 = arith.constant 0 : i32
    return %c0_i32, %c0_i32_0 : i32, i32
  }
}

</mosaic_0001>

<bundles_post_ra>
// kernel: tpu_custom_call.1
= control target key start
LH: loop header
LB: loop body
LE: loop exit
PB: predicated region body
PF: predicated region fallthrough
CT: control target
= control target key end

     0   :  { %s2175_s0 = inlined_call_operand.vmem [shape: f32[8,2,128], index: 0, kind: input, shape index: {}]   ;;  %s2176_s1 = inlined_call_operand.vmem [shape: f32[32,128], index: 1, kind: input, shape index: {}]   ;;  %s2177_s2 = inlined_call_operand.vmem [shape: f32[1,64,128], index: 2, kind: input, shape index: {}]   ;;  %s2178_s3 = inlined_call_operand.vmem [shape: f32[1,1,128], index: 3, kind: input, shape index: {}]   ;;  %s2179_s4 = inlined_call_operand.vmem [shape: f32[1,128], index: 4, kind: input, shape index: {}]   ;;  %s2180_s5 = inlined_call_operand.vmem [shape: f32[1,128], index: 5, kind: input, shape index: {}]   ;;  %s2181_s6 = inlined_call_operand.vmem [shape: f32[64,14], index: 6, kind: input, shape index: {}]   ;;  %s2182_s7 = inlined_call_operand.vmem [shape: f32[64,1], index: 7, kind: input, shape index: {}]   ;;  %s2183_s8 = inlined_call_operand.vmem [shape: f32[64,2], index: 8, kind: input, shape index: {}]   ;;  %s2184_s9 = inlined_call_operand.vmem [shape: f32[2,64], index: 9, kind: input, shape index: {}]   ;;  %s2185_s10 = inlined_call_operand.vmem [shape: f32[32,32], index: 10, kind: input, shape index: {}]   ;;  %s2186_s11 = inlined_call_operand.vmem [shape: f32[1,32], index: 11, kind: input, shape index: {}]   ;;  %s2187_s12 = inlined_call_operand.vmem [shape: f32[64,32], index: 12, kind: input, shape index: {}]   ;;  %s2188_s13 = inlined_call_operand.vmem [shape: f32[1,32], index: 13, kind: input, shape index: {}]   ;;  %s2189_s14 = inlined_call_operand.vmem [shape: f32[32,4], index: 14, kind: input, shape index: {}]   ;;  %s2190_s15 = inlined_call_operand.vmem [shape: f32[1,4], index: 15, kind: input, shape index: {}]   ;;  %s2191_s16 = inlined_call_operand.hbm [shape: f32[2,4], index: 16, kind: output, shape index: {}]  }
   0x1   :  { %2193 = sst [smem:[#allocation6_spill]] %s2175_s0 }
   0x2   :  { %v1591_v0 = vld [vmem:[%s2176_s1 + $0x18] sm:$0xff]  ;;  %v1596_v1 = vld [vmem:[%s2176_s1 + $0x10] sm:$0xff]  ;;  %v1602_v2 = vld [vmem:[%s2176_s1 + $0x8] sm:$0xff] }
   0x3   :  { %86 = vmatpush.msra.mxu0 %v1591_v0  ;;  %196 = vmatpush.msra.mxu2 %v1591_v0 }
   0x4   :  { %505 = vmatpush.msra.mxu3 %v1591_v0 }
   0x5   :  { %87 = vmatpush.msra.mxu0 %v1596_v1  ;;  %197 = vmatpush.msra.mxu2 %v1596_v1 }
   0x6   :  { %21 = vsyncpa [#allocation4], 0  ;;  %v1611_v3 = vld [vmem:[%s2176_s1] sm:$0xff]  ;;  %506 = vmatpush.msra.mxu3 %v1596_v1  ;;  %v1498_v4 = vmov 0.0   ;;  %s2194_s30 = sld [smem:[#allocation6_spill]]  ;;  %s1499_s20 = smov 64  }
   0x7   :  { %88 = vmatpush.msra.mxu0 %v1602_v2  ;;  %198 = vmatpush.msra.mxu2 %v1602_v2  ;;  %v1630_v8 = vld [vmem:[%s2179_s4] ss:$0 sm:$0xff]  ;;  %s1500_s21 = smov 32   ;;  %v1648_v19 = vld [vmem:[%s2177_s2 + $0x38] sm:$0xff]  ;;  %v1653_v20 = vld [vmem:[%s2177_s2 + $0x30] sm:$0xff]  ;;  %vm70_vm0 = vcmask 261120  }
   0x8   :  { %507 = vmatpush.msra.mxu3 %v1602_v2  ;;  %v1635_v9 = vld [vmem:[%s2180_s5] ss:$0 sm:$0xff]  ;;  %141 = vmatpush.msra.mxu1 %v1648_v19  ;;  %v1660_v21 = vld [vmem:[%s2177_s2 + $0x28] sm:$0xff]  ;;  %v1676_v23 = vld [vmem:[%s2177_s2 + $0x18] sm:$0xff]  ;;  %vm129_vm1 = vcmask 523264   ;;  %vm178_vm2 = vcmask 254976  }
   0x9   :  { %89 = vmatpush.msra.mxu0 %v1611_v3  ;;  %199 = vmatpush.msra.mxu2 %v1611_v3  ;;  %v1668_v22 = vld [vmem:[%s2177_s2 + $0x20] sm:$0xff]  ;;  %v1684_v24 = vld [vmem:[%s2177_s2 + $0x10] sm:$0xff]  ;;  %v1692_v25 = vld [vmem:[%s2177_s2 + $0x8] sm:$0xff]  ;;  %vm984_vm3 = vcmask 1045504   ;;  %vm959_vm4 = vcmask 113664   ;;  %vm1103_vm5 = vcmask 1041408  }
   0xa   :  { %90 = vmatmul.f32.vlgmr.msra.gmra.mxu0 %v1498_v4  ;;  %508 = vmatpush.msra.mxu3 %v1611_v3  ;;  %v1705_v28 = vld [vmem:[%s2177_s2] sm:$0xff]  ;;  %vm1078_vm6 = vcmask 15360   ;;  %s1502_s17 = smov [#allocation3]   ;;  %vm1316_vm7 = vcmask 25600  }
   0xb   :  { %608 = vmatpush.msrb.mxu2 %v1591_v0  ;;  %245 = vmatpush.msrb.mxu0 %v1648_v19  ;;  %v1744_v31 = vld [vmem:[%s2178_s3] ss:$0 sm:$0xff] }
   0xc   :  { %v69_v5 = vld [vmem:[%s2194_s30] sm:$0x3]  ;;  %657 = vmatpush.msrb.mxu3 %v1648_v19  ;;  %142 = vmatpush.msra.mxu1 %v1653_v20  ;;  %v1335_v34 = vld [vmem:[%s2194_s30 + $0x2] sm:$0x3]  ;;  %v1338_v4 = vld [vmem:[%s2194_s30 + $0x4] sm:$0x3] }
   0xd   :  { %609 = vmatpush.msrb.mxu2 %v1596_v1  ;;  %246 = vmatpush.msrb.mxu0 %v1653_v20 }
   0xe   :  { %658 = vmatpush.msrb.mxu3 %v1653_v20  ;;  %143 = vmatpush.msra.mxu1 %v1660_v21 }
   0xf   :  { %610 = vmatpush.msrb.mxu2 %v1602_v2  ;;  %247 = vmatpush.msrb.mxu0 %v1660_v21 }
  0x10   :  { %659 = vmatpush.msrb.mxu3 %v1660_v21  ;;  %144 = vmatpush.msra.mxu1 %v1668_v22 }
  0x11   :  { %611 = vmatpush.msrb.mxu2 %v1611_v3  ;;  %248 = vmatpush.msrb.mxu0 %v1668_v22 }
  0x12   :  { %660 = vmatpush.msrb.mxu3 %v1668_v22  ;;  %145 = vmatpush.msra.mxu1 %v1676_v23 }
  0x13   :  { %249 = vmatpush.msrb.mxu0 %v1676_v23 }
  0x14   :  { %661 = vmatpush.msrb.mxu3 %v1676_v23  ;;  %146 = vmatpush.msra.mxu1 %v1684_v24 }
  0x15   :  { %250 = vmatpush.msrb.mxu0 %v1684_v24 }
  0x16   :  { %662 = vmatpush.msrb.mxu3 %v1684_v24  ;;  %147 = vmatpush.msra.mxu1 %v1692_v25 }
  0x17   :  { %251 = vmatpush.msrb.mxu0 %v1692_v25 }
  0x18   :  { %663 = vmatpush.msrb.mxu3 %v1692_v25  ;;  %148 = vmatpush.msra.mxu1 %v1705_v28 }
  0x19   :  { %252 = vmatpush.msrb.mxu0 %v1705_v28 }
  0x1a   :  { %348 = vmatpush.msrb.mxu1 %v1648_v19  ;;  %664 = vmatpush.msrb.mxu3 %v1705_v28 }
  0x1b   :  { %299 = vmatpush.msra.mxu0 %v1591_v0 }
  0x1c   :  { %349 = vmatpush.msrb.mxu1 %v1653_v20 }
  0x1d   :  { %300 = vmatpush.msra.mxu0 %v1596_v1 }
  0x1e   :  { %350 = vmatpush.msrb.mxu1 %v1660_v21 }
  0x1f   :  { %301 = vmatpush.msra.mxu0 %v1602_v2 }
  0x20   :  { %351 = vmatpush.msrb.mxu1 %v1668_v22 }
  0x21   :  { %302 = vmatpush.msra.mxu0 %v1611_v3 }
  0x22   :  { %352 = vmatpush.msrb.mxu1 %v1676_v23 }
  0x24   :  { %353 = vmatpush.msrb.mxu1 %v1684_v24 }
  0x26   :  { %354 = vmatpush.msrb.mxu1 %v1692_v25 }
  0x28   :  { %355 = vmatpush.msrb.mxu1 %v1705_v28 }
  0x87   :  { %v91_v6 = vpop.f32.mrf.mxu0 }
  0x88   :  { %v94_v7 = vadd.f32 %v91_v6, %v69_v5 }
  0x8a   :  { %1392 = vtanh.f32 %v94_v7 }
  0x90   :  { %v1393_v10 = vpop.eup %1392 }
  0x91   :  { %v99_v11 = vmul.f32 %v1393_v10, %v1630_v8 }
  0x93   :  { %v103_v12 = vadd.f32 %v1635_v9, %v99_v11 }
  0x95   :  { %106 = vrot.lane.b32.xlu0 %v103_v12, %s1499_s20  ;;  %v104_v15 = vmul.f32 0.0, %v103_v12 }
 0x107   :  { %v107_v13 = vpop.permute.xlu0 %106 }
 0x108   :  { %v109_v14 = vmul.f32 %v107_v13, %v103_v12 }
 0x10a   :  { %111 = vrot.lane.b32.xlu0 %v109_v14, %s1500_s21 }
 0x17c   :  { %v112_v16 = vpop.permute.xlu0 %111 }
 0x17d   :  { %v1641_v17 = vadd.f32 %v112_v16, %v104_v15 }
 0x17f   :  { %1394 = vtanh.f32 %v1641_v17 }
 0x185   :  { %v1395_v18 = vpop.eup %1394 }
 0x186   :  { %117 = vrot.lane.b32.xlu1 %v1395_v18, %s1499_s20 }
 0x1f8   :  { %v118_v26 = vpop.permute.xlu1 %117 }
 0x1f9   :  { %v120_v27 = vmul.f32 %v118_v26, %v103_v12 }
 0x1fb   :  { %122 = vrot.lane.b32.xlu1 %v120_v27, %s1500_s21 }
 0x26d   :  { %v123_v29 = vpop.permute.xlu1 %122 }
 0x26e   :  { %1336 = vmatmul.msk.f32.vlgmr.msra.gmra.mxu2 %vm70_vm0, %v123_v29  ;;  %v125_v30 = vsel %vm70_vm0, %v123_v29, 0.0 }
 0x26f   :  { %1334 = vmatmul.msk.f32.vlgmr.msra.gmra.mxu1 %vm129_vm1, %v125_v30  ;;  %760 = vmatpush.msra.mxu2 %v1648_v19 }
 0x270   :  { %451 = vmatpush.msra.mxu1 %v1648_v19 }
 0x271   :  { %761 = vmatpush.msra.mxu2 %v1653_v20 }
 0x272   :  { %452 = vmatpush.msra.mxu1 %v1653_v20 }
 0x273   :  { %762 = vmatpush.msra.mxu2 %v1660_v21 }
 0x274   :  { %453 = vmatpush.msra.mxu1 %v1660_v21 }
 0x275   :  { %763 = vmatpush.msra.mxu2 %v1668_v22 }
 0x276   :  { %454 = vmatpush.msra.mxu1 %v1668_v22 }
 0x277   :  { %764 = vmatpush.msra.mxu2 %v1676_v23 }
 0x278   :  { %455 = vmatpush.msra.mxu1 %v1676_v23 }
 0x279   :  { %765 = vmatpush.msra.mxu2 %v1684_v24 }
 0x27a   :  { %456 = vmatpush.msra.mxu1 %v1684_v24 }
 0x27b   :  { %766 = vmatpush.msra.mxu2 %v1692_v25 }
 0x27c   :  { %457 = vmatpush.msra.mxu1 %v1692_v25 }
 0x27d   :  { %767 = vmatpush.msra.mxu2 %v1705_v28 }
 0x27e   :  { %458 = vmatpush.msra.mxu1 %v1705_v28 }
 0x2ec   :  { %v150_v32 = vpop.f32.mrf.mxu1 }
 0x2ed   :  { %v151_v33 = vadd.f32 %v1744_v31, %v150_v32 }
 0x2ef   :  { %1396 = vtanh.f32 %v151_v33 }
 0x2f1   :  { %v201_v35 = vpop.f32.mrf.mxu2 }
 0x2f2   :  { %v204_v36 = vadd.f32 %v1335_v34, %v201_v35 }
 0x2f4   :  { %1398 = vtanh.f32 %v204_v36 }
 0x2f5   :  { %v1397_v37 = vpop.eup %1396 }
 0x2f6   :  { %v154_v38 = vmul.f32 %v1397_v37, %v1630_v8 }
 0x2f8   :  { %v155_v39 = vadd.f32 %v1635_v9, %v154_v38 }
 0x2fa   :  { %v1399_v40 = vpop.eup %1398  ;;  %158 = vrot.lane.b32.xlu2 %v155_v39, %s1499_s20  ;;  %v156_v47 = vmul.f32 0.0, %v155_v39 }
 0x2fb   :  { %v206_v41 = vmul.f32 %v1399_v40, %v1630_v8 }
 0x2fd   :  { %v207_v42 = vadd.f32 %v1635_v9, %v206_v41 }
 0x2ff   :  { %v208_v50 = vmul.f32 %v207_v42, %v1641_v17 }
 0x302   :  { %210 = vrot.lane.b32.xlu2 %v207_v42, %s1499_s20 }
 0x354   :  { %v159_v43 = vpop.permute.xlu2 %158 }
 0x355   :  { %v161_v44 = vmul.f32 %v159_v43, %v155_v39  ;;  %v1341_v43 = vld [vmem:[%s2194_s30 + $0x6] sm:$0x3] }
 0x357   :  { %163 = vrot.lane.b32.xlu0 %v161_v44, %s1500_s21 }
 0x35c   :  { %v211_v45 = vpop.permute.xlu2 %210 }
 0x35d   :  { %v213_v46 = vmul.f32 %v211_v45, %v207_v42 }
 0x35f   :  { %215 = vrot.lane.b32.xlu1 %v213_v46, %s1500_s21 }
 0x3c9   :  { %v164_v48 = vpop.permute.xlu0 %163 }
 0x3ca   :  { %v166_v49 = vadd.f32 %v164_v48, %v156_v47 }
 0x3cc   :  { %1400 = vtanh.f32 %v166_v49 }
 0x3d1   :  { %v216_v51 = vpop.permute.xlu1 %215 }
 0x3d2   :  { %v1401_v52 = vpop.eup %1400  ;;  %v218_v53 = vadd.f32 %v216_v51, %v208_v50 }
 0x3d3   :  { %169 = vrot.lane.b32.xlu2 %v1401_v52, %s1499_s20 }
 0x3d4   :  { %1402 = vtanh.f32 %v218_v53 }
 0x3da   :  { %v1403_v54 = vpop.eup %1402 }
 0x3db   :  { %221 = vrot.lane.b32.xlu0 %v1403_v54, %s1499_s20 }
 0x42d   :  { %v170_v55 = vpop.permute.xlu2 %169 }
 0x42e   :  { %v1761_v56 = vmul.f32 %v170_v55, %v155_v39 }
 0x430   :  { %230 = vrot.lane.b32.xlu2 %v1761_v56, %s1499_s20 }
 0x44d   :  { %v222_v57 = vpop.permute.xlu0 %221 }
 0x44e   :  { %v224_v58 = vmul.f32 %v222_v57, %v207_v42 }
 0x450   :  { %226 = vrot.lane.b32.xlu1 %v224_v58, %s1500_s21 }
 0x48a   :  { %v231_v59 = vpop.permute.xlu2 %230 }
 0x4c2   :  { %v227_v60 = vpop.permute.xlu1 %226 }
 0x4c3   :  { %v233_v61 = vsel %vm70_vm0, %v227_v60, %v231_v59 }
 0x4c4   :  { %1337 = vmatmul.msk.f32.vlgmr.msrb.gmra.mxu0 %vm129_vm1, %v233_v61 }
 0x4c5   :  { %402 = vmatpush.msrb.mxu0 %v1591_v0 }
 0x4c7   :  { %403 = vmatpush.msrb.mxu0 %v1596_v1 }
 0x4c9   :  { %404 = vmatpush.msrb.mxu0 %v1602_v2 }
 0x4cb   :  { %405 = vmatpush.msrb.mxu0 %v1611_v3 }
 0x4cc   :  { %1339 = vmatmul.msk.f32.vlgmr.msra.gmra.mxu0 %vm70_vm0, %v227_v60 }
 0x4cd   :  { %554 = vmatpush.msra.mxu0 %v1648_v19 }
 0x4cf   :  { %555 = vmatpush.msra.mxu0 %v1653_v20 }
 0x4d1   :  { %556 = vmatpush.msra.mxu0 %v1660_v21 }
 0x4d3   :  { %557 = vmatpush.msra.mxu0 %v1668_v22 }
 0x4d5   :  { %558 = vmatpush.msra.mxu0 %v1676_v23 }
 0x4d7   :  { %559 = vmatpush.msra.mxu0 %v1684_v24 }
 0x4d9   :  { %560 = vmatpush.msra.mxu0 %v1692_v25 }
 0x4db   :  { %561 = vmatpush.msra.mxu0 %v1705_v28 }
 0x541   :  { %v254_v62 = vpop.f32.mrf.mxu0 }
 0x542   :  { %v255_v63 = vadd.f32 %v1744_v31, %v254_v62 }
 0x544   :  { %1404 = vtanh.f32 %v255_v63 }
 0x549   :  { %v304_v5 = vpop.f32.mrf.mxu0 }
 0x54a   :  { %v1405_v6 = vpop.eup %1404  ;;  %v307_v7 = vadd.f32 %v1338_v4, %v304_v5 }
 0x54b   :  { %v258_v10 = vmul.f32 %v1405_v6, %v1630_v8 }
 0x54c   :  { %1406 = vtanh.f32 %v307_v7 }
 0x54d   :  { %v259_v11 = vadd.f32 %v1635_v9, %v258_v10 }
 0x54f   :  { %262 = vrot.lane.b32.xlu1 %v259_v11, %s1499_s20  ;;  %v260_v32 = vmul.f32 %v259_v11, %v166_v49 }
 0x552   :  { %v1407_v12 = vpop.eup %1406 }
 0x553   :  { %v309_v13 = vmul.f32 %v1407_v12, %v1630_v8  ;;  %v1344_v12 = vld [vmem:[%s2194_s30 + $0x8] sm:$0x3] }
 0x555   :  { %v310_v14 = vadd.f32 %v1635_v9, %v309_v13 }
 0x557   :  { %313 = vrot.lane.b32.xlu0 %v310_v14, %s1499_s20  ;;  %v311_v26 = vmul.f32 %v310_v14, %v218_v53 }
 0x5c1   :  { %v263_v15 = vpop.permute.xlu1 %262 }
 0x5c2   :  { %v265_v16 = vmul.f32 %v263_v15, %v259_v11 }
 0x5c4   :  { %267 = vrot.lane.b32.xlu0 %v265_v16, %s1500_s21 }
 0x5c9   :  { %v314_v17 = vpop.permute.xlu0 %313 }
 0x5ca   :  { %v316_v18 = vmul.f32 %v314_v17, %v310_v14 }
 0x5cc   :  { %318 = vrot.lane.b32.xlu2 %v316_v18, %s1500_s21 }
 0x626   :  { %v319_v27 = vpop.permute.xlu2 %318 }
 0x627   :  { %v321_v29 = vadd.f32 %v319_v27, %v311_v26 }
 0x629   :  { %1408 = vtanh.f32 %v321_v29 }
 0x62f   :  { %v1409_v30 = vpop.eup %1408 }
 0x630   :  { %324 = vrot.lane.b32.xlu1 %v1409_v30, %s1499_s20 }
 0x636   :  { %v268_v33 = vpop.permute.xlu0 %267 }
 0x637   :  { %v270_v34 = vadd.f32 %v268_v33, %v260_v32 }
 0x639   :  { %1410 = vtanh.f32 %v270_v34 }
 0x63f   :  { %v1411_v35 = vpop.eup %1410 }
 0x640   :  { %273 = vrot.lane.b32.xlu2 %v1411_v35, %s1499_s20 }
 0x69a   :  { %v274_v36 = vpop.permute.xlu2 %273 }
 0x69b   :  { %v1795_v37 = vmul.f32 %v274_v36, %v259_v11 }
 0x69d   :  { %333 = vrot.lane.b32.xlu1 %v1795_v37, %s1499_s20 }
 0x6a2   :  { %v325_v38 = vpop.permute.xlu1 %324 }
 0x6a3   :  { %v327_v39 = vmul.f32 %v325_v38, %v310_v14 }
 0x6a5   :  { %329 = vrot.lane.b32.xlu0 %v327_v39, %s1500_s21 }
 0x70f   :  { %v334_v40 = vpop.permute.xlu1 %333 }
 0x717   :  { %v330_v41 = vpop.permute.xlu0 %329 }
 0x718   :  { %v336_v42 = vsel %vm70_vm0, %v330_v41, %v334_v40  ;;  %1342 = vmatmul.msk.f32.vlgmr.msrb.gmra.mxu0 %vm70_vm0, %v330_v41 }
 0x719   :  { %1340 = vmatmul.msk.f32.vlgmr.msrb.gmra.mxu1 %vm129_vm1, %v336_v42  ;;  %814 = vmatpush.msrb.mxu0 %v1591_v0 }
 0x71a   :  { %711 = vmatpush.msrb.mxu1 %v1591_v0 }
 0x71b   :  { %815 = vmatpush.msrb.mxu0 %v1596_v1 }
 0x71c   :  { %712 = vmatpush.msrb.mxu1 %v1596_v1 }
 0x71d   :  { %816 = vmatpush.msrb.mxu0 %v1602_v2 }
 0x71e   :  { %713 = vmatpush.msrb.mxu1 %v1602_v2 }
 0x71f   :  { %817 = vmatpush.msrb.mxu0 %v1611_v3 }
 0x720   :  { %714 = vmatpush.msrb.mxu1 %v1611_v3 }
 0x795   :  { %v407_v44 = vpop.f32.mrf.mxu0 }
 0x796   :  { %v410_v45 = vadd.f32 %v1341_v43, %v407_v44  ;;  %v357_v46 = vpop.f32.mrf.mxu1 }
 0x797   :  { %v358_v0 = vadd.f32 %v1744_v31, %v357_v46  ;;  %v1347_v46 = vld [vmem:[%s2194_s30 + $0xa] sm:$0x3] }
 0x798   :  { %1412 = vtanh.f32 %v410_v45 }
 0x799   :  { %1414 = vtanh.f32 %v358_v0 }
 0x79e   :  { %v1413_v1 = vpop.eup %1412 }
 0x79f   :  { %v1415_v47 = vpop.eup %1414  ;;  %v412_v48 = vmul.f32 %v1413_v1, %v1630_v8 }
 0x7a0   :  { %v361_v2 = vmul.f32 %v1415_v47, %v1630_v8 }
 0x7a1   :  { %v413_v49 = vadd.f32 %v1635_v9, %v412_v48 }
 0x7a2   :  { %v362_v3 = vadd.f32 %v1635_v9, %v361_v2 }
 0x7a3   :  { %416 = vrot.lane.b32.xlu2 %v413_v49, %s1499_s20  ;;  %v414_v54 = vmul.f32 %v413_v49, %v321_v29 }
 0x7a4   :  { %365 = vrot.lane.b32.xlu0 %v362_v3, %s1499_s20  ;;  %v363_v57 = vmul.f32 %v362_v3, %v270_v34 }
 0x7fd   :  { %v417_v50 = vpop.permute.xlu2 %416 }
 0x7fe   :  { %v419_v51 = vmul.f32 %v417_v50, %v413_v49 }
 0x800   :  { %421 = vrot.lane.b32.xlu1 %v419_v51, %s1500_s21 }
 0x816   :  { %v366_v52 = vpop.permute.xlu0 %365 }
 0x817   :  { %v368_v53 = vmul.f32 %v366_v52, %v362_v3 }
 0x819   :  { %370 = vrot.lane.b32.xlu2 %v368_v53, %s1500_s21 }
 0x872   :  { %v422_v55 = vpop.permute.xlu1 %421 }
 0x873   :  { %v424_v58 = vadd.f32 %v422_v55, %v414_v54  ;;  %v371_v59 = vpop.permute.xlu2 %370 }
 0x874   :  { %v373_v60 = vadd.f32 %v371_v59, %v363_v57 }
 0x875   :  { %1416 = vtanh.f32 %v424_v58 }
 0x876   :  { %1418 = vtanh.f32 %v373_v60 }
 0x87b   :  { %v1417_v61 = vpop.eup %1416 }
 0x87c   :  { %v1419_v62 = vpop.eup %1418  ;;  %427 = vrot.lane.b32.xlu0 %v1417_v61, %s1499_s20 }
 0x87d   :  { %376 = vrot.lane.b32.xlu1 %v1419_v62, %s1499_s20 }
 0x8ee   :  { %v428_v63 = vpop.permute.xlu0 %427 }
 0x8ef   :  { %v430_v4 = vmul.f32 %v428_v63, %v413_v49  ;;  %v377_v5 = vpop.permute.xlu1 %376 }
 0x8f0   :  { %v1825_v6 = vmul.f32 %v377_v5, %v362_v3 }
 0x8f1   :  { %432 = vrot.lane.b32.xlu2 %v430_v4, %s1500_s21 }
 0x8f2   :  { %436 = vrot.lane.b32.xlu0 %v1825_v6, %s1499_s20 }
 0x94b   :  { %v433_v7 = vpop.permute.xlu2 %432 }
 0x94c   :  { %1345 = vmatmul.msk.f32.vlgmr.msra.gmra.mxu3 %vm70_vm0, %v433_v7 }
 0x964   :  { %v437_v10 = vpop.permute.xlu0 %436 }
 0x965   :  { %v439_v11 = vsel %vm70_vm0, %v433_v7, %v437_v10 }
 0x966   :  { %1343 = vmatmul.msk.f32.vlgmr.msra.gmra.mxu1 %vm129_vm1, %v439_v11 }
 0x967   :  { %863 = vmatpush.msra.mxu1 %v1648_v19 }
 0x969   :  { %864 = vmatpush.msra.mxu1 %v1653_v20 }
 0x96b   :  { %865 = vmatpush.msra.mxu1 %v1660_v21 }
 0x96d   :  { %866 = vmatpush.msra.mxu1 %v1668_v22 }
 0x96f   :  { %867 = vmatpush.msra.mxu1 %v1676_v23 }
 0x971   :  { %868 = vmatpush.msra.mxu1 %v1684_v24 }
 0x973   :  { %869 = vmatpush.msra.mxu1 %v1692_v25 }
 0x975   :  { %870 = vmatpush.msra.mxu1 %v1705_v28 }
 0x9cf   :  { %v510_v13 = vpop.f32.mrf.mxu3 }
 0x9d0   :  { %v513_v19 = vadd.f32 %v1344_v12, %v510_v13 }
 0x9d2   :  { %1420 = vtanh.f32 %v513_v19  ;;  %v1350_v19 = vld [vmem:[%s2194_s30 + $0xc] sm:$0x3] }
 0x9d8   :  { %v1421_v20 = vpop.eup %1420 }
 0x9d9   :  { %v515_v21 = vmul.f32 %v1421_v20, %v1630_v8 }
 0x9db   :  { %v516_v22 = vadd.f32 %v1635_v9, %v515_v21 }
 0x9dd   :  { %519 = vrot.lane.b32.xlu1 %v516_v22, %s1499_s20  ;;  %v517_v30 = vmul.f32 %v516_v22, %v424_v58 }
 0x9e3   :  { %v460_v23 = vpop.f32.mrf.mxu1 }
 0x9e4   :  { %v461_v24 = vadd.f32 %v1744_v31, %v460_v23 }
 0x9e6   :  { %1422 = vtanh.f32 %v461_v24 }
 0x9ec   :  { %v1423_v25 = vpop.eup %1422 }
 0x9ed   :  { %v464_v28 = vmul.f32 %v1423_v25, %v1630_v8 }
 0x9ef   :  { %v465_v14 = vadd.f32 %v1635_v9, %v464_v28 }
 0x9f1   :  { %468 = vrot.lane.b32.xlu2 %v465_v14, %s1499_s20  ;;  %v466_v26 = vmul.f32 %v465_v14, %v373_v60 }
 0xa4b   :  { %v469_v15 = vpop.permute.xlu2 %468 }
 0xa4c   :  { %v471_v16 = vmul.f32 %v469_v15, %v465_v14 }
 0xa4e   :  { %473 = vrot.lane.b32.xlu1 %v471_v16, %s1500_s21 }
 0xa4f   :  { %v520_v17 = vpop.permute.xlu1 %519 }
 0xa50   :  { %v522_v18 = vmul.f32 %v520_v17, %v516_v22 }
 0xa52   :  { %524 = vrot.lane.b32.xlu0 %v522_v18, %s1500_s21 }
 0xac0   :  { %v474_v27 = vpop.permute.xlu1 %473 }
 0xac1   :  { %v476_v29 = vadd.f32 %v474_v27, %v466_v26 }
 0xac3   :  { %1424 = vtanh.f32 %v476_v29 }
 0xac4   :  { %v525_v32 = vpop.permute.xlu0 %524 }
 0xac5   :  { %v527_v33 = vadd.f32 %v525_v32, %v517_v30 }
 0xac7   :  { %1426 = vtanh.f32 %v527_v33 }
 0xac9   :  { %v1425_v34 = vpop.eup %1424 }
 0xaca   :  { %479 = vrot.lane.b32.xlu0 %v1425_v34, %s1499_s20 }
 0xacd   :  { %v1427_v35 = vpop.eup %1426 }
 0xace   :  { %530 = vrot.lane.b32.xlu2 %v1427_v35, %s1499_s20 }
 0xb28   :  { %v531_v36 = vpop.permute.xlu2 %530 }
 0xb29   :  { %v533_v38 = vmul.f32 %v531_v36, %v516_v22 }
 0xb2b   :  { %535 = vrot.lane.b32.xlu1 %v533_v38, %s1500_s21 }
 0xb3c   :  { %v480_v39 = vpop.permute.xlu0 %479 }
 0xb3d   :  { %v1856_v40 = vmul.f32 %v480_v39, %v465_v14 }
 0xb3f   :  { %539 = vrot.lane.b32.xlu2 %v1856_v40, %s1499_s20 }
 0xb99   :  { %v540_v41 = vpop.permute.xlu2 %539 }
 0xb9d   :  { %v536_v42 = vpop.permute.xlu1 %535 }
 0xb9e   :  { %v542_v43 = vsel %vm70_vm0, %v536_v42, %v540_v41  ;;  %1348 = vmatmul.msk.f32.vlgmr.msrb.gmra.mxu2 %vm70_vm0, %v536_v42 }
 0xb9f   :  { %1346 = vmatmul.msk.f32.vlgmr.msra.gmra.mxu0 %vm129_vm1, %v542_v43 }
 0xc1c   :  { %v563_v44 = vpop.f32.mrf.mxu0 }
 0xc1d   :  { %v564_v45 = vadd.f32 %v1744_v31, %v563_v44 }
 0xc1f   :  { %1428 = vtanh.f32 %v564_v45 }
 0xc21   :  { %v613_v0 = vpop.f32.mrf.mxu2 }
 0xc22   :  { %v616_v1 = vadd.f32 %v1347_v46, %v613_v0  ;;  %v1353_v0 = vld [vmem:[%s2194_s30 + $0xe] sm:$0x3]  ;;  %s1325_s30 = sshll.u32 %s2191_s16, 4  ;;  %s1326_s30 = int_to_ptr.hbm [resolvable:$true] %s1325_s30 }
 0xc24   :  { %1430 = vtanh.f32 %v616_v1 }
 0xc25   :  { %v1429_v47 = vpop.eup %1428 }
 0xc26   :  { %v567_v48 = vmul.f32 %v1429_v47, %v1630_v8 }
 0xc28   :  { %v568_v2 = vadd.f32 %v1635_v9, %v567_v48 }
 0xc2a   :  { %v1431_v49 = vpop.eup %1430  ;;  %571 = vrot.lane.b32.xlu0 %v568_v2, %s1499_s20  ;;  %v569_v55 = vmul.f32 %v568_v2, %v476_v29 }
 0xc2b   :  { %v618_v3 = vmul.f32 %v1431_v49, %v1630_v8 }
 0xc2d   :  { %v619_v50 = vadd.f32 %v1635_v9, %v618_v3 }
 0xc2f   :  { %622 = vrot.lane.b32.xlu1 %v619_v50, %s1499_s20  ;;  %v620_v60 = vmul.f32 %v619_v50, %v527_v33 }
 0xc9c   :  { %v572_v51 = vpop.permute.xlu0 %571 }
 0xc9d   :  { %v574_v52 = vmul.f32 %v572_v51, %v568_v2 }
 0xc9f   :  { %576 = vrot.lane.b32.xlu2 %v574_v52, %s1500_s21 }
 0xca1   :  { %v623_v53 = vpop.permute.xlu1 %622 }
 0xca2   :  { %v625_v54 = vmul.f32 %v623_v53, %v619_v50 }
 0xca4   :  { %627 = vrot.lane.b32.xlu0 %v625_v54, %s1500_s21 }
 0xcf9   :  { %v577_v57 = vpop.permute.xlu2 %576 }
 0xcfa   :  { %v579_v58 = vadd.f32 %v577_v57, %v569_v55 }
 0xcfc   :  { %1432 = vtanh.f32 %v579_v58 }
 0xd02   :  { %v1433_v59 = vpop.eup %1432 }
 0xd03   :  { %582 = vrot.lane.b32.xlu1 %v1433_v59, %s1499_s20 }
 0xd16   :  { %v628_v61 = vpop.permute.xlu0 %627 }
 0xd17   :  { %v630_v62 = vadd.f32 %v628_v61, %v620_v60 }
 0xd19   :  { %1434 = vtanh.f32 %v630_v62 }
 0xd1f   :  { %v1435_v63 = vpop.eup %1434 }
 0xd20   :  { %633 = vrot.lane.b32.xlu2 %v1435_v63, %s1499_s20 }
 0xd75   :  { %v583_v4 = vpop.permute.xlu1 %582 }
 0xd76   :  { %v1877_v5 = vmul.f32 %v583_v4, %v568_v2 }
 0xd78   :  { %642 = vrot.lane.b32.xlu1 %v1877_v5, %s1499_s20 }
 0xd7a   :  { %v634_v7 = vpop.permute.xlu2 %633 }
 0xd7b   :  { %v636_v10 = vmul.f32 %v634_v7, %v619_v50 }
 0xd7d   :  { %638 = vrot.lane.b32.xlu0 %v636_v10, %s1500_s21 }
 0xdea   :  { %v643_v11 = vpop.permute.xlu1 %642 }
 0xdef   :  { %v639_v12 = vpop.permute.xlu0 %638 }
 0xdf0   :  { %v645_v13 = vsel %vm70_vm0, %v639_v12, %v643_v11  ;;  %1351 = vmatmul.msk.f32.vlgmr.msrb.gmra.mxu1 %vm70_vm0, %v639_v12 }
 0xdf1   :  { %1349 = vmatmul.msk.f32.vlgmr.msrb.gmra.mxu3 %vm129_vm1, %v645_v13 }
 0xe6d   :  { %v716_v20 = vpop.f32.mrf.mxu1 }
 0xe6e   :  { %v719_v21 = vadd.f32 %v1350_v19, %v716_v20 }
 0xe70   :  { %1436 = vtanh.f32 %v719_v21 }
 0xe74   :  { %v666_v22 = vpop.f32.mrf.mxu3 }
 0xe75   :  { %v667_v23 = vadd.f32 %v1744_v31, %v666_v22 }
 0xe76   :  { %v1437_v24 = vpop.eup %1436 }
 0xe77   :  { %v721_v25 = vmul.f32 %v1437_v24, %v1630_v8  ;;  %1438 = vtanh.f32 %v667_v23 }
 0xe79   :  { %v722_v28 = vadd.f32 %v1635_v9, %v721_v25 }
 0xe7b   :  { %725 = vrot.lane.b32.xlu0 %v722_v28, %s1499_s20  ;;  %v723_v29 = vmul.f32 %v722_v28, %v630_v62 }
 0xe7d   :  { %v1439_v14 = vpop.eup %1438 }
 0xe7e   :  { %v670_v15 = vmul.f32 %v1439_v14, %v1630_v8 }
 0xe80   :  { %v671_v16 = vadd.f32 %v1635_v9, %v670_v15 }
 0xe82   :  { %674 = vrot.lane.b32.xlu2 %v671_v16, %s1499_s20  ;;  %v672_v33 = vmul.f32 %v671_v16, %v579_v58 }
 0xedc   :  { %v675_v17 = vpop.permute.xlu2 %674 }
 0xedd   :  { %v677_v18 = vmul.f32 %v675_v17, %v671_v16  ;;  %v586_v17 = vmax.f32 %v1877_v5, 0.0 }
 0xedf   :  { %679 = vrot.lane.b32.xlu1 %v677_v18, %s1500_s21  ;;  %v173_v18 = vmax.f32 %v1761_v56, 0.0 }
 0xeed   :  { %v726_v26 = vpop.permute.xlu0 %725 }
 0xeee   :  { %v728_v27 = vmul.f32 %v726_v26, %v722_v28 }
 0xef0   :  { %730 = vrot.lane.b32.xlu2 %v728_v27, %s1500_s21 }
 0xf4a   :  { %v731_v30 = vpop.permute.xlu2 %730 }
 0xf4b   :  { %v733_v32 = vadd.f32 %v731_v30, %v723_v29 }
 0xf4d   :  { %1440 = vtanh.f32 %v733_v32 }
 0xf51   :  { %v680_v34 = vpop.permute.xlu1 %679 }
 0xf52   :  { %v682_v35 = vadd.f32 %v680_v34, %v672_v33  ;;  %v1039_v33 = vld [vmem:[%s2185_s10 + $0x10] sm:$0xff]  ;;  %v1038_v34 = vld [vmem:[%s2185_s10 + $0x8] sm:$0xff] }
 0xf53   :  { %v1441_v36 = vpop.eup %1440 }
 0xf54   :  { %1442 = vtanh.f32 %v682_v35  ;;  %736 = vrot.lane.b32.xlu1 %v1441_v36, %s1499_s20 }
 0xf5a   :  { %v1443_v38 = vpop.eup %1442 }
 0xf5b   :  { %685 = vrot.lane.b32.xlu0 %v1443_v38, %s1499_s20 }
 0xfc6   :  { %v737_v39 = vpop.permute.xlu1 %736 }
 0xfc7   :  { %v739_v41 = vmul.f32 %v737_v39, %v722_v28 }
 0xfc9   :  { %741 = vrot.lane.b32.xlu2 %v739_v41, %s1500_s21 }
 0xfcd   :  { %v686_v42 = vpop.permute.xlu0 %685 }
 0xfce   :  { %v1900_v43 = vmul.f32 %v686_v42, %v671_v16  ;;  %v380_v42 = vmax.f32 %v1825_v6, 0.0  ;;  %v903_v6 = vld [vmem:[%s2181_s6] sm:$0xff] }
 0xfd0   :  { %745 = vrot.lane.b32.xlu0 %v1900_v43, %s1499_s20  ;;  %v689_v5 = vmax.f32 %v1900_v43, 0.0 }
0x1023   :  { %v742_v44 = vpop.permute.xlu2 %741 }
0x1024   :  { %1354 = vmatmul.msk.f32.vlgmr.msrb.gmra.mxu0 %vm70_vm0, %v742_v44 }
0x1042   :  { %v746_v45 = vpop.permute.xlu0 %745 }
0x1043   :  { %v748_v46 = vsel %vm70_vm0, %v742_v44, %v746_v45 }
0x1044   :  { %1352 = vmatmul.msk.f32.vlgmr.msra.gmra.mxu2 %vm129_vm1, %v748_v46 }
0x10a1   :  { %v819_v1 = vpop.f32.mrf.mxu0 }
0x10a2   :  { %v822_v47 = vadd.f32 %v1353_v0, %v819_v1  ;;  %v904_v1 = vld [vmem:[%s2181_s6 + $0x8] sm:$0xff] }
0x10a4   :  { %1444 = vtanh.f32 %v822_v47  ;;  %v905_v47 = vld [vmem:[%s2181_s6 + $0x10] sm:$0xff] }
0x10aa   :  { %v1445_v48 = vpop.eup %1444 }
0x10ab   :  { %v824_v2 = vmul.f32 %v1445_v48, %v1630_v8  ;;  %v1501_v48 = vmov 0  }
0x10ac   :  { %1385 = vset.pattern.permute.xlu1 %v1501_v48  ;;  %1384 = vset.pattern.permute.xlu0 %v1501_v48 }
0x10ad   :  { %v825_v49 = vadd.f32 %v1635_v9, %v824_v2  ;;  %v916_v2 = vld [vmem:[%s2182_s7 + $0x28] sm:$0xff]  ;;  %1383 = vset.pattern.permute.xlu2 %v1501_v48 }
0x10af   :  { %828 = vrot.lane.b32.xlu2 %v825_v49, %s1499_s20  ;;  %v826_v59 = vmul.f32 %v825_v49, %v733_v32  ;;  %v1040_v32 = vld [vmem:[%s2185_s10 + $0x18] sm:$0xff] }
0x10b0   :  { %1062 = vmatpush.msra.mxu0 %v1040_v32 }
0x10b2   :  { %1063 = vmatpush.msra.mxu0 %v1039_v33 }
0x10b4   :  { %1064 = vmatpush.msra.mxu0 %v1038_v34 }
0x10c7   :  { %v769_v3 = vpop.f32.mrf.mxu2 }
0x10c8   :  { %v770_v50 = vadd.f32 %v1744_v31, %v769_v3  ;;  %v914_v3 = vld [vmem:[%s2182_s7 + $0x18] sm:$0xff] }
0x10ca   :  { %1446 = vtanh.f32 %v770_v50  ;;  %v907_v50 = vld [vmem:[%s2181_s6 + $0x20] sm:$0xff] }
0x10d0   :  { %v1447_v51 = vpop.eup %1446 }
0x10d1   :  { %v773_v52 = vmul.f32 %v1447_v51, %v1630_v8  ;;  %v917_v51 = vld [vmem:[%s2182_s7 + $0x30] sm:$0xff] }
0x10d3   :  { %v774_v53 = vadd.f32 %v1635_v9, %v773_v52  ;;  %v911_v52 = vld [vmem:[%s2182_s7] sm:$0xff] }
0x10d5   :  { %777 = vrot.lane.b32.xlu1 %v774_v53, %s1499_s20  ;;  %v775_v63 = vmul.f32 %v774_v53, %v682_v35 }
0x1109   :  { %v829_v54 = vpop.permute.xlu2 %828 }
0x110a   :  { %v831_v55 = vmul.f32 %v829_v54, %v825_v49  ;;  %v912_v54 = vld [vmem:[%s2182_s7 + $0x8] sm:$0xff] }
0x110c   :  { %833 = vrot.lane.b32.xlu1 %v831_v55, %s1500_s21  ;;  %v1389_v55 = vld [vmem:[%s2186_s11] ss:$0 sm:$0xff]  ;;  %s1323_s11 = sshll.u32 %s1502_s17, 4  ;;  %s1324_s11 = int_to_ptr.vmem [resolvable:$true] %s1323_s11 }
0x1147   :  { %v778_v57 = vpop.permute.xlu1 %777 }
0x1148   :  { %v780_v58 = vmul.f32 %v778_v57, %v774_v53  ;;  %v909_v57 = vld [vmem:[%s2181_s6 + $0x30] sm:$0xff] }
0x114a   :  { %782 = vrot.lane.b32.xlu0 %v780_v58, %s1500_s21 }
0x117e   :  { %v834_v60 = vpop.permute.xlu1 %833 }
0x117f   :  { %v836_v61 = vadd.f32 %v834_v60, %v826_v59  ;;  %v1070_v60 = vld [vmem:[%s2183_s8] sm:$0xff] }
0x1181   :  { %1448 = vtanh.f32 %v836_v61  ;;  %v910_v61 = vld [vmem:[%s2181_s6 + $0x38] sm:$0xff] }
0x1187   :  { %v1449_v62 = vpop.eup %1448 }
0x1188   :  { %839 = vrot.lane.b32.xlu0 %v1449_v62, %s1499_s20  ;;  %v918_v62 = vld [vmem:[%s2182_s7 + $0x38] sm:$0xff] }
0x11bc   :  { %v783_v4 = vpop.permute.xlu0 %782 }
0x11bd   :  { %v785_v7 = vadd.f32 %v783_v4, %v775_v63  ;;  %v1071_v63 = vld [vmem:[%s2183_s8 + $0x8] sm:$0xff]  ;;  %v915_v4 = vld [vmem:[%s2182_s7 + $0x20] sm:$0xff] }
0x11bf   :  { %1450 = vtanh.f32 %v785_v7 }
0x11c5   :  { %v1451_v10 = vpop.eup %1450 }
0x11c6   :  { %788 = vrot.lane.b32.xlu2 %v1451_v10, %s1499_s20  ;;  %v913_v10 = vld [vmem:[%s2182_s7 + $0x10] sm:$0xff] }
0x11fa   :  { %v840_v11 = vpop.permute.xlu0 %839 }
0x11fb   :  { %v842_v12 = vmul.f32 %v840_v11, %v825_v49  ;;  %v906_v49 = vld [vmem:[%s2181_s6 + $0x18] sm:$0xff] }
0x11fc   :  { %v1073_v11 = vld [vmem:[%s2183_s8 + $0x18] sm:$0xff] }
0x11fd   :  { %844 = vrot.lane.b32.xlu1 %v842_v12, %s1500_s21  ;;  %v1074_v12 = vld [vmem:[%s2183_s8 + $0x20] sm:$0xff] }
0x1220   :  { %v789_v13 = vpop.permute.xlu2 %788 }
0x1221   :  { %v791_v19 = vmul.f32 %v789_v13, %v774_v53  ;;  %v908_v53 = vld [vmem:[%s2181_s6 + $0x28] sm:$0xff] }
0x1222   :  { %v1075_v13 = vld [vmem:[%s2183_s8 + $0x28] sm:$0xff] }
0x1223   :  { %848 = vrot.lane.b32.xlu2 %v791_v19, %s1499_s20  ;;  %v792_v39 = vmax.f32 %v791_v19, 0.0  ;;  %v1076_v19 = vld [vmem:[%s2183_s8 + $0x30] sm:$0xff] }
0x126f   :  { %v845_v20 = vpop.permute.xlu1 %844 }
0x127d   :  { %v849_v21 = vpop.permute.xlu2 %848 }
0x127e   :  { %v851_v22 = vsel %vm70_vm0, %v845_v20, %v849_v21  ;;  %v1077_v20 = vld [vmem:[%s2183_s8 + $0x38] sm:$0xff] }
0x127f   :  { %1355 = vmatmul.msk.f32.vlgmr.msra.gmra.mxu1 %vm129_vm1, %v851_v22 }
0x12fc   :  { %v872_v23 = vpop.f32.mrf.mxu1 }
0x12fd   :  { %v873_v24 = vadd.f32 %v1744_v31, %v872_v23  ;;  %v483_v31 = vmax.f32 %v1856_v40, 0.0  ;;  %v277_v40 = vmax.f32 %v1795_v37, 0.0  ;;  %v1037_v37 = vld [vmem:[%s2185_s10] sm:$0xff] }
0x12fe   :  { %1065 = vmatpush.msra.mxu0 %v1037_v37 }
0x12ff   :  { %1452 = vtanh.f32 %v873_v24 }
0x1305   :  { %v1453_v25 = vpop.eup %1452 }
0x1306   :  { %v876_v28 = vmul.f32 %v1453_v25, %v1630_v8 }
0x1308   :  { %v877_v14 = vadd.f32 %v1635_v9, %v876_v28 }
0x130a   :  { %880 = vrot.lane.b32.xlu0 %v877_v14, %s1499_s20  ;;  %v878_v8 = vmul.f32 %v877_v14, %v785_v7  ;;  %v1072_v7 = vld [vmem:[%s2183_s8 + $0x10] sm:$0xff] }
0x137c   :  { %v881_v15 = vpop.permute.xlu0 %880 }
0x137d   :  { %v883_v16 = vmul.f32 %v881_v15, %v877_v14 }
0x137f   :  { %885 = vrot.lane.b32.xlu1 %v883_v16, %s1500_s21 }
0x1387   :  { %588 = vrot.lane.b32.xlu1 %v586_v17, %s1500_s21 }
0x138f   :  { %175 = vrot.lane.b32.xlu1 %v173_v18, %s1500_s21 }
0x1397   :  { %485 = vrot.lane.b32.xlu1 %v483_v31, %s1500_s21 }
0x139f   :  { %946 = vperm.xlu1 %1385, %v916_v2  }
0x13a7   :  { %936 = vperm.xlu1 %1385, %v914_v3  }
0x13af   :  { %921 = vperm.xlu1 %1385, %v911_v52  }
0x13f1   :  { %v886_v9 = vpop.permute.xlu1 %885 }
0x13f2   :  { %v888_v26 = vadd.f32 %v886_v9, %v878_v8 }
0x13f4   :  { %1454 = vtanh.f32 %v888_v26 }
0x13f9   :  { %v589_v27 = vpop.permute.xlu1 %588 }
0x13fa   :  { %v1455_v29 = vpop.eup %1454  ;;  %591 = vst.msk [vmem:[#allocation2 + $0x8] sm:$0x3] %vm178_vm2, %v589_v27 }
0x13fb   :  { %891 = vrot.lane.b32.xlu2 %v1455_v29, %s1499_s20 }
0x1401   :  { %v176_v56 = vpop.permute.xlu1 %175 }
0x1402   :  { %179 = vst.msk [vmem:[#allocation2] sm:$0x3] %vm178_vm2, %v176_v56 }
0x1403   :  { %691 = vrot.lane.b32.xlu2 %v689_v5, %s1500_s21 }
0x1409   :  { %v486_v30 = vpop.permute.xlu1 %485 }
0x140a   :  { %488 = vst.msk [vmem:[#allocation2 + $0x6] sm:$0x3] %vm178_vm2, %v486_v30 }
0x140b   :  { %279 = vrot.lane.b32.xlu2 %v277_v40, %s1500_s21 }
0x1411   :  { %v947_v27 = vpop.permute.xlu1 %946 }
0x1413   :  { %956 = vperm.xlu2 %1383, %v918_v62  }
0x141b   :  { %941 = vperm.xlu2 %1383, %v915_v4  }
0x1423   :  { %931 = vperm.xlu2 %1383, %v913_v10  }
0x1455   :  { %v892_v35 = vpop.permute.xlu2 %891 }
0x1456   :  { %v1956_v36 = vmul.f32 %v892_v35, %v877_v14 }
0x1458   :  { %1046 = vrot.lane.b32.xlu0 %v1956_v36, %s1500_s21 }
0x145d   :  { %v692_v38 = vpop.permute.xlu2 %691 }
0x145e   :  { %694 = vst.msk [vmem:[#allocation2 + $0xa] sm:$0x3] %vm178_vm2, %v692_v38 }
0x1460   :  { %794 = vrot.lane.b32.xlu0 %v792_v39, %s1500_s21 }
0x1465   :  { %v280_v41 = vpop.permute.xlu2 %279 }
0x1466   :  { %282 = vst.msk [vmem:[#allocation2 + $0x2] sm:$0x3] %vm178_vm2, %v280_v41 }
0x1468   :  { %382 = vrot.lane.b32.xlu0 %v380_v42, %s1500_s21 }
0x146d   :  { %v957_v14 = vpop.permute.xlu2 %956 }
0x1470   :  { %951 = vperm.xlu0 %1384, %v917_v51  }
0x1475   :  { %v942_v17 = vpop.permute.xlu2 %941 }
0x1478   :  { %926 = vperm.xlu0 %1384, %v912_v54  }
0x147d   :  { %v932_v42 = vpop.permute.xlu2 %931 }
0x14ca   :  { %v1965_v43 = vpop.permute.xlu0 %1046 }
0x14cb   :  { %1365 = vmatmul.msk.f32.vlgmr.msra.gmra.mxu0 %vm70_vm0, %v1965_v43 }
0x14d2   :  { %v795_v44 = vpop.permute.xlu0 %794 }
0x14d3   :  { %797 = vst.msk [vmem:[#allocation2 + $0xc] sm:$0x3] %vm178_vm2, %v795_v44 }
0x14da   :  { %v383_v45 = vpop.permute.xlu0 %382  ;;  %v902_v46 = vld [vmem:[#allocation2 + $0x8] sm:$0x3f] }
0x14db   :  { %385 = vst.msk [vmem:[#allocation2 + $0x4] sm:$0x3] %vm178_vm2, %v383_v45  ;;  %1356 = vmatpush.msk.msra.mxu3 %vm984_vm3, %v902_v46 }
0x14e2   :  { %v901_v0 = vld [vmem:[#allocation2] sm:$0xff]  ;;  %v952_v8 = vpop.permute.xlu0 %951 }
0x14e3   :  { %1003 = vmatpush.msra.mxu3 %v901_v0 }
0x14e4   :  { %1357 = vmatmul.msk.f32.vlgmr.msra.gmra.mxu3 %vm959_vm4, %v903_v6 }
0x14ea   :  { %v927_v30 = vpop.permute.xlu0 %926 }
0x14ec   :  { %1358 = vmatmul.msk.f32.gmra.mxu3 %vm959_vm4, %v904_v1 }
0x14f4   :  { %1359 = vmatmul.msk.f32.gmra.mxu3 %vm959_vm4, %v905_v47  ;;  %v937_v47 = vpop.permute.xlu1 %936 }
0x14fc   :  { %1360 = vmatmul.msk.f32.gmra.mxu3 %vm959_vm4, %v906_v49 }
0x1504   :  { %1361 = vmatmul.msk.f32.gmra.mxu3 %vm959_vm4, %v907_v50 }
0x150c   :  { %1362 = vmatmul.msk.f32.gmra.mxu3 %vm959_vm4, %v908_v53 }
0x1514   :  { %1363 = vmatmul.msk.f32.gmra.mxu3 %vm959_vm4, %v909_v57 }
0x151c   :  { %1364 = vmatmul.msk.f32.gmra.mxu3 %vm959_vm4, %v910_v61 }
0x1548   :  { %v1067_v58 = vpop.f32.mrf.mxu0 }
0x1549   :  { %v1068_v59 = vadd.f32 %v1389_v55, %v1067_v58 }
0x154b   :  { %1366 = vmatpush.msk.msrb.mxu2 %vm1103_vm5, %v1068_v59  ;;  %v922_v59 = vpop.permute.xlu1 %921 }
0x154c   :  { %1367 = vmatmul.msk.f32.vlgmr.msrb.gmra.mxu2 %vm1078_vm6, %v1070_v60 }
0x1554   :  { %1368 = vmatmul.msk.f32.gmra.mxu2 %vm1078_vm6, %v1071_v63 }
0x155c   :  { %1369 = vmatmul.msk.f32.gmra.mxu2 %vm1078_vm6, %v1072_v7  ;;  %v895_v7 = vmax.f32 %v1956_v36, 0.0 }
0x1564   :  { %1370 = vmatmul.msk.f32.gmra.mxu2 %vm1078_vm6, %v1073_v11 }
0x1567   :  { %v1005_v21 = vpop.f32.mrf.mxu3 }
0x1568   :  { %v2096_v60 = vadd.f32 %v1005_v21, %v922_v59 }
0x156a   :  { %v1029_v62 = vmax.f32 %v2096_v60, 0.0  ;;  %v1251_v60 = vld [vmem:[%s2187_s12 + $0x8] sm:$0xff] }
0x156c   :  { %1371 = vmatmul.msk.f32.gmra.mxu2 %vm1078_vm6, %v1074_v12 }
0x156f   :  { %v1008_v22 = vpop.f32.mrf.mxu3 }
0x1570   :  { %v2071_v34 = vadd.f32 %v1008_v22, %v927_v30 }
0x1572   :  { %v1030_v39 = vmax.f32 %v2071_v34, 0.0  ;;  %v1256_v34 = vld [vmem:[%s2187_s12 + $0x30] sm:$0xff] }
0x1574   :  { %1372 = vmatmul.msk.f32.gmra.mxu2 %vm1078_vm6, %v1075_v13 }
0x1577   :  { %v1011_v23 = vpop.f32.mrf.mxu3 }
0x1578   :  { %v2080_v45 = vadd.f32 %v1011_v23, %v932_v42 }
0x157a   :  { %v1031_v48 = vmax.f32 %v2080_v45, 0.0  ;;  %v1257_v45 = vld [vmem:[%s2187_s12 + $0x38] sm:$0xff] }
0x157b   :  { %1273 = vmatpush.msrb.mxu1 %v1257_v45 }
0x157c   :  { %1373 = vmatmul.msk.f32.gmra.mxu2 %vm1078_vm6, %v1076_v19 }
0x157d   :  { %1274 = vmatpush.msrb.mxu1 %v1256_v34 }
0x157f   :  { %v1014_v28 = vpop.f32.mrf.mxu3 }
0x1580   :  { %v2089_v50 = vadd.f32 %v1014_v28, %v937_v47 }
0x1582   :  { %v1032_v55 = vmax.f32 %v2089_v50, 0.0  ;;  %v1253_v50 = vld [vmem:[%s2187_s12 + $0x18] sm:$0xff] }
0x1584   :  { %1374 = vmatmul.msk.f32.gmra.mxu2 %vm1078_vm6, %v1077_v20 }
0x1587   :  { %v1017_v16 = vpop.f32.mrf.mxu3 }
0x1588   :  { %v2062_v31 = vadd.f32 %v1017_v16, %v942_v17 }
0x158a   :  { %v1033_v26 = vmax.f32 %v2062_v31, 0.0 }
0x158f   :  { %v1020_v9 = vpop.f32.mrf.mxu3 }
0x1590   :  { %v2065_v5 = vadd.f32 %v1020_v9, %v947_v27 }
0x1592   :  { %v1034_v32 = vmax.f32 %v2065_v5, 0.0 }
0x1597   :  { %v1023_v33 = vpop.f32.mrf.mxu3 }
0x1598   :  { %v2073_v35 = vadd.f32 %v1023_v33, %v952_v8 }
0x159a   :  { %v1035_v44 = vmax.f32 %v2073_v35, 0.0 }
0x159f   :  { %v1026_v6 = vpop.f32.mrf.mxu3 }
0x15a0   :  { %v1027_v2 = vadd.f32 %v1026_v6, %v957_v14 }
0x15a2   :  { %v1036_v51 = vmax.f32 %v1027_v2, 0.0 }
0x15cf   :  { %v1124_v24 = vpop.f32.mrf.mxu2 }
0x15d0   :  { %v1148_v4 = vmul.f32 %v1124_v24, %v1029_v62 }
0x15d2   :  { %v1156_v10 = vsel %vm70_vm0, %v1148_v4, 0.0  ;;  %v1287_v4 = vld [vmem:[%s2189_s14 + $0x10] sm:$0xff] }
0x15d7   :  { %v1127_v25 = vpop.f32.mrf.mxu2 }
0x15d8   :  { %v1149_v46 = vmul.f32 %v1127_v25, %v1030_v39 }
0x15da   :  { %v1159_v3 = vsel %vm70_vm0, %v1149_v46, 0.0 }
0x15df   :  { %v1130_v15 = vpop.f32.mrf.mxu2 }
0x15e0   :  { %v1150_v52 = vmul.f32 %v1130_v15, %v1031_v48 }
0x15e2   :  { %v1162_v58 = vsel %vm70_vm0, %v1150_v52, 0.0 }
0x15e7   :  { %v1133_v18 = vpop.f32.mrf.mxu2 }
0x15e8   :  { %v1151_v61 = vmul.f32 %v1133_v18, %v1032_v55 }
0x15ea   :  { %v1165_v63 = vsel %vm70_vm0, %v1151_v61, 0.0 }
0x15ef   :  { %v1136_v29 = vpop.f32.mrf.mxu2 }
0x15f0   :  { %v1152_v56 = vmul.f32 %v1136_v29, %v1033_v26 }
0x15f2   :  { %v1168_v40 = vsel %vm70_vm0, %v1152_v56, 0.0 }
0x15f3   :  { %1169 = vadd.xlane.f32.xlu2 %v1168_v40 }
0x15f7   :  { %v1139_v37 = vpop.f32.mrf.mxu2 }
0x15f8   :  { %v1153_v38 = vmul.f32 %v1139_v37, %v1034_v32 }
0x15fa   :  { %v1171_v41 = vsel %vm70_vm0, %v1153_v38, 0.0 }
0x15fb   :  { %1172 = vadd.xlane.f32.xlu1 %v1171_v41 }
0x15ff   :  { %v1142_v0 = vpop.f32.mrf.mxu2 }
0x1600   :  { %v1154_v1 = vmul.f32 %v1142_v0, %v1035_v44 }
0x1602   :  { %v1174_v49 = vsel %vm70_vm0, %v1154_v1, 0.0 }
0x1603   :  { %1175 = vadd.xlane.f32.xlu0 %v1174_v49  ;;  %1160 = vadd.xlane.f32.xlu1 %v1159_v3 }
0x1607   :  { %v1145_v53 = vpop.f32.mrf.mxu2 }
0x1608   :  { %v1155_v54 = vmul.f32 %v1145_v53, %v1036_v51 }
0x160a   :  { %v1177_v57 = vsel %vm70_vm0, %v1155_v54, 0.0 }
0x160b   :  { %1178 = vadd.xlane.f32.xlu2 %v1177_v57  ;;  %1163 = vadd.xlane.f32.xlu0 %v1162_v58 }
0x1613   :  { %1166 = vadd.xlane.f32.xlu2 %v1165_v63  ;;  %v1288_v63 = vld [vmem:[%s2189_s14 + $0x18] sm:$0xff] }
0x161b   :  { %1157 = vadd.xlane.f32.xlu2 %v1156_v10 }
0x161c   :  { %897 = vrot.lane.b32.xlu1 %v895_v7, %s1500_s21 }
0x1666   :  { %v1170_v11 = vpop.xlane.xlu2 %1169 }
0x1667   :  { %v1184_v21 = vmul.f32 0.5, %v1170_v11  ;;  %v1286_v11 = vld [vmem:[%s2189_s14 + $0x8] sm:$0xff] }
0x166e   :  { %v1173_v12 = vpop.xlane.xlu1 %1172 }
0x166f   :  { %v1185_v20 = vmul.f32 0.5, %v1173_v12  ;;  %v1285_v12 = vld [vmem:[%s2189_s14] sm:$0xff] }
0x1676   :  { %v1176_v13 = vpop.xlane.xlu0 %1175  ;;  %v1161_v24 = vpop.xlane.xlu1 %1160 }
0x1677   :  { %v1186_v19 = vmul.f32 0.5, %v1176_v13  ;;  %v1181_v14 = vmul.f32 0.5, %v1161_v24  ;;  %v1390_v13 = vld [vmem:[%s2188_s13] ss:$0 sm:$0xff] }
0x1679   :  { %1456 = vtanh.f32 %v1186_v19 }
0x167a   :  { %1458 = vtanh.f32 %v1185_v20 }
0x167b   :  { %1460 = vtanh.f32 %v1184_v21 }
0x167e   :  { %v1179_v22 = vpop.xlane.xlu2 %1178  ;;  %v1164_v23 = vpop.xlane.xlu0 %1163 }
0x167f   :  { %v1187_v25 = vmul.f32 0.5, %v1179_v22  ;;  %v1182_v36 = vmul.f32 0.5, %v1164_v23  ;;  %v1457_v28 = vpop.eup %1456 }
0x1680   :  { %v1459_v15 = vpop.eup %1458  ;;  %v1202_v17 = vmul.f32 0.5, %v1457_v28 }
0x1681   :  { %1462 = vtanh.f32 %v1187_v25  ;;  %v1461_v16 = vpop.eup %1460  ;;  %v1201_v27 = vmul.f32 0.5, %v1459_v15 }
0x1682   :  { %1464 = vtanh.f32 %v1182_v36  ;;  %v1200_v56 = vmul.f32 0.5, %v1461_v16  ;;  %v1210_v40 = vadd.f32 0.5, %v1202_v17 }
0x1683   :  { %1466 = vtanh.f32 %v1181_v14  ;;  %v1209_v37 = vadd.f32 0.5, %v1201_v27 }
0x1684   :  { %v1208_v42 = vadd.f32 0.5, %v1200_v56  ;;  %v1219_v1 = vmul.f32 %v1210_v40, %v1035_v44 }
0x1685   :  { %v1218_v52 = vmul.f32 %v1209_v37, %v1034_v32 }
0x1686   :  { %v1167_v18 = vpop.xlane.xlu2 %1166  ;;  %v1217_v54 = vmul.f32 %v1208_v42, %v1033_v26  ;;  %v1212_v26 = vld [vmem:[%s2184_s9] sm:$0x3] }
0x1687   :  { %v1463_v8 = vpop.eup %1462  ;;  %v1183_v9 = vmul.f32 0.5, %v1167_v18 }
0x1688   :  { %v1203_v29 = vmul.f32 0.5, %v1463_v8  ;;  %v1465_v33 = vpop.eup %1464 }
0x1689   :  { %1468 = vtanh.f32 %v1183_v9  ;;  %v1467_v41 = vpop.eup %1466  ;;  %v1198_v46 = vmul.f32 0.5, %v1465_v33 }
0x168a   :  { %v1211_v30 = vadd.f32 0.5, %v1203_v29  ;;  %v1197_v49 = vmul.f32 0.5, %v1467_v41 }
0x168b   :  { %v1206_v53 = vadd.f32 0.5, %v1198_v46 }
0x168c   :  { %v1220_v38 = vmul.f32 %v1211_v30, %v1036_v51  ;;  %v1205_v57 = vadd.f32 0.5, %v1197_v49 }
0x168d   :  { %v1215_v44 = vmul.f32 %v1206_v53, %v1031_v48  ;;  %v1254_v48 = vld [vmem:[%s2187_s12 + $0x20] sm:$0xff] }
0x168e   :  { %1232 = vmatpush.msrb.mxu0 %v1220_v38  ;;  %v1158_v6 = vpop.xlane.xlu2 %1157  ;;  %v898_v0 = vpop.permute.xlu1 %897  ;;  %v1214_v5 = vmul.f32 %v1205_v57, %v1030_v39  ;;  %v1255_v39 = vld [vmem:[%s2187_s12 + $0x28] sm:$0xff] }
0x168f   :  { %v1469_v47 = vpop.eup %1468  ;;  %v1180_v2 = vmul.f32 0.5, %v1158_v6  ;;  %1275 = vmatpush.msrb.mxu1 %v1255_v39 }
0x1690   :  { %v1199_v3 = vmul.f32 0.5, %v1469_v47  ;;  %1233 = vmatpush.msrb.mxu0 %v1219_v1 }
0x1691   :  { %1470 = vtanh.f32 %v1180_v2  ;;  %1276 = vmatpush.msrb.mxu1 %v1254_v48 }
0x1692   :  { %v1207_v51 = vadd.f32 0.5, %v1199_v3  ;;  %1234 = vmatpush.msrb.mxu0 %v1218_v52 }
0x1693   :  { %1277 = vmatpush.msrb.mxu1 %v1253_v50 }
0x1694   :  { %1235 = vmatpush.msrb.mxu0 %v1217_v54  ;;  %v1216_v35 = vmul.f32 %v1207_v51, %v1032_v55  ;;  %v1252_v55 = vld [vmem:[%s2187_s12 + $0x10] sm:$0xff] }
0x1695   :  { %1278 = vmatpush.msrb.mxu1 %v1252_v55 }
0x1696   :  { %1236 = vmatpush.msrb.mxu0 %v1216_v35 }
0x1697   :  { %v1471_v58 = vpop.eup %1470  ;;  %1279 = vmatpush.msrb.mxu1 %v1251_v60 }
0x1698   :  { %v1196_v59 = vmul.f32 0.5, %v1471_v58  ;;  %1237 = vmatpush.msrb.mxu0 %v1215_v44 }
0x169a   :  { %v1204_v32 = vadd.f32 0.5, %v1196_v59  ;;  %1238 = vmatpush.msrb.mxu0 %v1214_v5 }
0x169c   :  { %v1213_v31 = vmul.f32 %v1204_v32, %v1029_v62  ;;  %v1250_v62 = vld [vmem:[%s2187_s12] sm:$0xff] }
0x169d   :  { %1280 = vmatpush.msrb.mxu1 %v1250_v62 }
0x169e   :  { %1239 = vmatpush.msrb.mxu0 %v1213_v31 }
0x169f   :  { %1375 = vmatmul.msk.f32.vlgmr.msrb.gmra.mxu0 %vm129_vm1, %v1212_v26 }
0x16a0   :  { %1308 = vmatpush.msra.mxu0 %v1288_v63 }
0x16a2   :  { %1309 = vmatpush.msra.mxu0 %v1287_v4 }
0x16a4   :  { %1310 = vmatpush.msra.mxu0 %v1286_v11 }
0x16a6   :  { %1311 = vmatpush.msra.mxu0 %v1285_v12 }
0x171c   :  { %v1241_v61 = vpop.f32.mrf.mxu0 }
0x171d   :  { %1246 = vrot.lane.b32.xlu0 %v1241_v61, %s1500_s21 }
0x178f   :  { %v1247_v7 = vpop.permute.xlu0 %1246 }
0x1790   :  { %v1249_v10 = vsel %vm70_vm0, %v1965_v43, %v1247_v7  ;;  %v1391_v43 = vld [vmem:[%s2190_s15] ss:$0 sm:$0xff] }
0x1791   :  { %1376 = vmatmul.msk.f32.vlgmr.msrb.gmra.mxu1 %vm129_vm1, %v1249_v10 }
0x180e   :  { %v1282_v19 = vpop.f32.mrf.mxu1 }
0x180f   :  { %v1283_v20 = vadd.f32 %v1390_v13, %v1282_v19 }
0x1811   :  { %1377 = vmatmul.msk.f32.vlgmr.msra.gmra.mxu0 %vm70_vm0, %v1283_v20 }
0x188e   :  { %v1313_v21 = vpop.f32.mrf.mxu0 }
0x188f   :  { %v1314_v22 = vadd.f32 %v1391_v43, %v1313_v21 }
0x1891   :  { %1317 = vst.msk [vmem:[#allocation3] sm:$0x3] %vm1316_vm7, %v1314_v22 }
0x1892   :  { %1328 = dma.vmem_to_hbm [thread:$0]  %s1324_s11, 32, %s1326_s30, [#allocation4]  }
0x1893   :  { %1496 = dma.done.wait [#allocation4], 32  }
0x1894   :  { %1497 = vsyncadd [#allocation4], 4294967264 }
0x1895   :  { %1333 = vsyncpa [#allocation4], 1 }

</bundles_post_ra>
